<compile_context>
chip_gen: v7x
topology: tpu7x:2x2x1
jax: 0.10.0
libtpu: 0.0.40
codegen_flags: <defaults>
</compile_context>

<pallas_src>
import functools
import math

import jax
import jax.numpy as jnp
import numpy as np
from jax.experimental import pallas as pl
from jax.experimental.pallas import tpu as pltpu

_VMEM = pl.BlockSpec(memory_space=pltpu.MemorySpace.VMEM)
_SMEM = pl.BlockSpec(memory_space=pltpu.MemorySpace.SMEM)
_BF16 = jnp.bfloat16

# vector-slab row indices (built in _build_packed, consumed by the kernel)
_V_BCONV1, _V_GAMMA1, _V_BETA1, _V_BLIN1 = 0, 1, 2, 3
_V_BCONV2, _V_GAMMA2, _V_BETA2, _V_BLIN2 = 4, 5, 6, 7
_V_BCONV3, _V_GAMMA3, _V_BETA3 = 8, 9, 10
_V_ROWS = 16


# ------------------------- in-kernel building blocks -------------------------

def _packed_conv(x, adj_bf, inv_deg, w_ref, v_ref, w_row, v_row, n_nodes, hidden):
    """relu -> DenseSAGEConv (pool & embed packed along output lanes) -> relu -> BN.

    Returns the (N, WPAD) post-BN activations: columns [0:H) are the pool
    branch, [H:2H) the embed branch (gnn3 only uses [0:H)); padded lanes are
    exactly zero because the padded weight / bias / gamma / beta lanes are zero.
    """
    x0 = jnp.maximum(x, 0.0)
    x0_b = x0.astype(_BF16)
    msg = jnp.dot(adj_bf, x0_b, preferred_element_type=jnp.float32) * inv_deg
    msg_b = msg.astype(_BF16)

    w_rel = w_ref[w_row:w_row + hidden, :]                     # (H, WPAD) bf16
    w_root = w_ref[w_row + hidden:w_row + 2 * hidden, :]       # (H, WPAD) bf16
    conv = (jnp.dot(msg_b, w_rel, preferred_element_type=jnp.float32)
            + jnp.dot(x0_b, w_root, preferred_element_type=jnp.float32)
            + v_ref[v_row:v_row + 1, :])
    x1 = jnp.maximum(conv, 0.0)

    if n_nodes > 1:
        # BatchNorm1d, training-mode batch statistics (eps=1e-5).
        gamma = v_ref[v_row + 1:v_row + 2, :]
        beta = v_ref[v_row + 2:v_row + 3, :]
        mean = jnp.mean(x1, axis=0, keepdims=True)
        var = jnp.mean((x1 - mean) * (x1 - mean), axis=0, keepdims=True)
        x1 = (x1 - mean) * jax.lax.rsqrt(var + 1e-5) * gamma + beta
    return x1


def _graph_stats(adj_f32):
    """bf16 adjacency + f32 inverse-degree + ||adj||_F^2 for a pooled graph."""
    deg = jnp.maximum(jnp.sum(adj_f32, axis=-1, keepdims=True), 1.0)
    inv_deg = pl.reciprocal(deg, approx=True)
    adj_sq = jnp.sum(jnp.sum(adj_f32 * adj_f32, axis=-1, keepdims=True),
                     axis=0, keepdims=True)
    return adj_f32.astype(_BF16), inv_deg, adj_sq


def _pool_stage(x, adj_bf, inv_deg, adj_sq, w_ref, v_ref,
                w_conv_row, w_lin_row, v_row, k, n_nodes, hidden):
    """gnnX_pool + gnnX_embed (shared relu/message/BN) + dense_diff_pool."""
    xbn = _packed_conv(x, adj_bf, inv_deg, w_ref, v_ref, w_conv_row, v_row,
                       n_nodes, hidden)
    x_pool = xbn[:, :hidden]                                   # pool branch
    y = xbn[:, hidden:2 * hidden]                              # embed branch

    # pool head: lin -> relu -> softmax over k clusters
    w_lin = w_ref[w_lin_row:w_lin_row + hidden, :]             # (H, WPAD) bf16
    logits = (jnp.dot(x_pool.astype(_BF16), w_lin,
                      preferred_element_type=jnp.float32)
              + v_ref[v_row + 3:v_row + 4, :])
    logits = jnp.maximum(logits, 0.0)[:, :k]                   # (N, k)
    m = jnp.max(logits, axis=-1, keepdims=True)
    ex = jnp.exp(logits - m)
    s = ex * pl.reciprocal(jnp.sum(ex, axis=-1, keepdims=True), approx=True)

    s_b = s.astype(_BF16)
    y_b = y.astype(_BF16)
    st_x = jax.lax.dot_general(s_b, y_b, (((0,), (0,)), ((), ())),
                               preferred_element_type=jnp.float32)      # (k, H)
    st_adj = jax.lax.dot_general(s_b, adj_bf, (((0,), (0,)), ((), ())),
                                 preferred_element_type=jnp.float32)    # (k, N)
    out_adj = jnp.dot(st_adj.astype(_BF16), s_b,
                      preferred_element_type=jnp.float32)               # (k, k)

    # link loss via ||adj - s s^T||_F^2 = ||adj||^2 - 2 tr(s^T adj s) + ||s^T s||^2
    sts = jax.lax.dot_general(s_b, s_b, (((0,), (0,)), ((), ())),
                              preferred_element_type=jnp.float32)       # (k, k)
    rr = jax.lax.broadcasted_iota(jnp.int32, out_adj.shape, 0)
    cc = jax.lax.broadcasted_iota(jnp.int32, out_adj.shape, 1)
    tr = jnp.sum(jnp.sum(jnp.where(rr == cc, out_adj, 0.0),
                         axis=-1, keepdims=True), axis=0, keepdims=True)
    sts_sq = jnp.sum(jnp.sum(sts * sts, axis=-1, keepdims=True),
                     axis=0, keepdims=True)
    link_sq = jnp.maximum(adj_sq - 2.0 * tr + sts_sq, 0.0)
    link = jnp.sqrt(link_sq) * (1.0 / float(n_nodes * n_nodes))
    ent = jnp.sum(jnp.sum(-s * jnp.log(s + 1e-15), axis=-1, keepdims=True),
                  axis=0, keepdims=True) * (1.0 / float(n_nodes))
    return st_x, out_adj, link, ent


# ------------------------------ fused kernel ---------------------------------

def _fused_forward_kernel(h_ref, adj_ref, invdeg_ref, adjsq_ref, w_ref, v_ref,
                          wh_ref, bh_ref, out_ref, *, n, hidden, feat,
                          run_stage1, run_stage2, k1, k2):
    x = h_ref[...]                         # (N, C)  f32
    adj_bf = adj_ref[...]                  # (N, N)  bf16
    inv_deg = invdeg_ref[...]              # (N, 1)  f32 (exact, host-computed)
    adj_sq = adjsq_ref[0, 0]               # scalar  f32 (exact, host-computed)
    nodes = n
    link = None
    ent = None

    if run_stage1:                         # gnn1_pool / gnn1_embed + diff-pool
        x, adj_f, l1, e1 = _pool_stage(x, adj_bf, inv_deg, adj_sq, w_ref, v_ref,
                                       0, 2 * hidden, _V_BCONV1, k1,
                                       nodes, hidden)
        link, ent = l1, e1
        nodes = k1
        adj_bf, inv_deg, adj_sq = _graph_stats(adj_f)
    if run_stage2:                         # gnn2_pool / gnn2_embed + diff-pool
        x, adj_f, l2, e2 = _pool_stage(x, adj_bf, inv_deg, adj_sq, w_ref, v_ref,
                                       3 * hidden, 5 * hidden, _V_BCONV2, k2,
                                       nodes, hidden)
        link = l2 if link is None else link + l2
        ent = e2 if ent is None else ent + e2
        nodes = k2
        adj_bf, inv_deg, adj_sq = _graph_stats(adj_f)

    # gnn3_embed (no lin): columns [0:H) hold the output, padded lanes are 0.
    y = _packed_conv(x, adj_bf, inv_deg, w_ref, v_ref, 6 * hidden, _V_BCONV3,
                     nodes, hidden)

    # Readout: node-mean, then ONE lane-dense (1, PACK) row holding
    # [z | value | link | ent | 0...].  wh_ref rows >= hidden and the padded
    # lanes of y are exactly zero, so no slicing is needed before the matmul.
    ymean = jnp.mean(y, axis=0, keepdims=True)                 # (1, WPAD)
    row = (jnp.dot(ymean, wh_ref[...], preferred_element_type=jnp.float32)
           + bh_ref[...])
    if link is not None:
        lane = jax.lax.broadcasted_iota(jnp.int32, row.shape, 1)
        row = row + jnp.where(lane == feat + 1, link, 0.0)
        row = row + jnp.where(lane == feat + 2, ent, 0.0)
    out_ref[...] = row


# -------------------------------- wrappers -----------------------------------

def _vmem_limit(n, wpad, k1):
    rows = max(n, k1)
    b = 2 * n * n                       # bf16 adjacency operand
    b += 10 * 4 * rows * wpad           # f32 activations / logits / softmax
    b += 6 * 2 * rows * wpad            # bf16 matmul operand copies
    b += 2 * 4 * k1 * rows              # s^T adj and pooled intermediates
    b += 4 << 20                        # slabs, head, biases, headroom
    return int(min(max(b, 4 << 20), 64 << 20))   # v7x physical VMEM = 64 MiB


def _cost_estimate(n, c, pack, wpad, run_stage1, run_stage2, k1, k2):
    flops, trans = 0, 0
    byts = (2 * n * n + 4 * n * c + 4 * n + 4
            + 2 * 8 * c * wpad + 4 * _V_ROWS * wpad + 4 * wpad * pack
            + 8 * pack)

    def stage(nn, kk):
        f = 2 * nn * nn * c                       # adj @ relu(x) message
        f += 2 * nn * c * wpad * 2                # packed rel/root conv
        f += 2 * nn * c * wpad                    # pool lin
        f += 2 * kk * nn * (c + nn + kk + kk)     # s^T y, s^T adj, out_adj, s^T s
        t = 2 * nn * kk                           # softmax exp + entropy log
        return f, t

    nodes = n
    if run_stage1:
        f, t = stage(nodes, k1); flops += f; trans += t; nodes = k1
    if run_stage2:
        f, t = stage(nodes, k2); flops += f; trans += t; nodes = k2
    flops += 2 * nodes * nodes * c + 4 * nodes * c * wpad + 2 * wpad * pack
    return pl.CostEstimate(flops=int(flops), transcendentals=int(trans),
                           bytes_accessed=int(byts))


def manager_forward(params, h, adj, mask=None):
    # mask is accepted but unused, exactly like the reference forward.
    del mask
    n, hidden = h.shape
    feat = params["w_z"].shape[1]
    pack = params["b_head"].shape[1]
    wpad = params["w_slab"].shape[1]
    k1 = params["gnn1_pool"]["w_lin"].shape[1]
    k2 = params["gnn2_pool"]["w_lin"].shape[1]
    run_stage1 = n >= 100
    run_stage2 = n >= 25

    # Exact f32 graph statistics on the host side so the kernel only needs the
    # bf16 adjacency (half the HBM->VMEM bytes for the dominant operand).
    adj_f32 = adj.astype(jnp.float32)
    deg = jnp.maximum(jnp.sum(adj_f32, axis=-1, keepdims=True), 1.0)
    inv_deg = 1.0 / deg
    adj_sq = jnp.sum(adj_f32 * adj_f32).reshape(1, 1)
    adj_bf = adj_f32.astype(_BF16)

    kernel = functools.partial(
        _fused_forward_kernel, n=n, hidden=hidden, feat=feat,
        run_stage1=run_stage1, run_stage2=run_stage2, k1=k1, k2=k2)
    inputs = [h.astype(jnp.float32), adj_bf, inv_deg, adj_sq,
              params["w_slab"], params["v_slab"],
              params["w_head"], params["b_head"]]
    in_specs = [_VMEM, _VMEM, _VMEM, _SMEM, _VMEM, _VMEM, _VMEM, _VMEM]

    out = pl.pallas_call(
        kernel,
        out_shape=jax.ShapeDtypeStruct((1, pack), jnp.float32),
        in_specs=in_specs,
        out_specs=_VMEM,
        compiler_params=pltpu.CompilerParams(
            vmem_limit_bytes=_vmem_limit(n, wpad, k1)),
        cost_estimate=_cost_estimate(n, hidden, pack, wpad,
                                     run_stage1, run_stage2, k1, k2),
    )(*inputs)

    z = out[:, :feat]
    value = out[:, feat:feat + 1]
    if run_stage2:
        l = out[0, feat + 1]
        e = out[0, feat + 2]
    else:
        l = jnp.float32(0.0)
        e = jnp.float32(0.0)
    return value, z, l, e


# ------------------------------ parameter init -------------------------------

def _init_linear(key, fan_in, fan_out, bias=True):
    kw, kb = jax.random.split(key)
    scale = 1.0 / math.sqrt(fan_in)
    w = jax.random.uniform(kw, (fan_in, fan_out), jnp.float32, -scale, scale)
    b = (jax.random.uniform(kb, (1, fan_out), jnp.float32, -scale, scale)
         if bias else None)
    return w, b


def init_g_sage(key, cin, chid, cout, lin=True):
    ks = jax.random.split(key, 3)
    w_rel, b_rel = _init_linear(ks[0], cin, chid)            # lin_rel (bias)
    w_root, _ = _init_linear(ks[1], cin, chid, bias=False)   # lin_root (no bias)
    p = dict(w_rel=w_rel, b_rel=b_rel, w_root=w_root,
             gamma=jnp.ones((1, chid), jnp.float32),
             beta=jnp.zeros((1, chid), jnp.float32))
    if lin:
        p["w_lin"], p["b_lin"] = _init_linear(ks[2], chid, cout)
    return p


def _build_packed(params, hidden, feat):
    """Coalesce all layer weights into two slabs + a padded readout head."""
    H = hidden
    k1 = params["gnn1_pool"]["w_lin"].shape[1]
    k2 = params["gnn2_pool"]["w_lin"].shape[1]
    wpad = 128 * max(1, math.ceil(max(2 * H, k1, k2) / 128))
    pack = 128 * max(1, math.ceil((feat + 3) / 128))

    def conv_block(pool_p, emb_p):
        # rows [0:H) = lin_rel, rows [H:2H) = lin_root; pool cols [0:H) and
        # embed cols [H:2H) so both branches share one wide MXU pass.
        if emb_p is None:
            rel, root = pool_p["w_rel"], pool_p["w_root"]
        else:
            rel = jnp.concatenate([pool_p["w_rel"], emb_p["w_rel"]], axis=1)
            root = jnp.concatenate([pool_p["w_root"], emb_p["w_root"]], axis=1)
        return jnp.concatenate([rel, root], axis=0)

    rows = ((8 * H + 15) // 16) * 16
    w = jnp.zeros((rows, wpad), jnp.float32)
    c1 = conv_block(params["gnn1_pool"], params["gnn1_embed"])
    c2 = conv_block(params["gnn2_pool"], params["gnn2_embed"])
    c3 = conv_block(params["gnn3_embed"], None)
    w = w.at[0:2 * H, 0:c1.shape[1]].set(c1)
    w = w.at[2 * H:3 * H, 0:k1].set(params["gnn1_pool"]["w_lin"])
    w = w.at[3 * H:5 * H, 0:c2.shape[1]].set(c2)
    w = w.at[5 * H:6 * H, 0:k2].set(params["gnn2_pool"]["w_lin"])
    w = w.at[6 * H:8 * H, 0:c3.shape[1]].set(c3)
    w_slab = w.astype(_BF16)

    def vec2(pa, pb, name):
        return jnp.concatenate([pa[name], pb[name]], axis=1)[0]

    p1p, p1e = params["gnn1_pool"], params["gnn1_embed"]
    p2p, p2e = params["gnn2_pool"], params["gnn2_embed"]
    p3 = params["gnn3_embed"]
    v = jnp.zeros((_V_ROWS, wpad), jnp.float32)
    v = v.at[_V_BCONV1, 0:2 * H].set(vec2(p1p, p1e, "b_rel"))
    v = v.at[_V_GAMMA1, 0:2 * H].set(vec2(p1p, p1e, "gamma"))
    v = v.at[_V_BETA1, 0:2 * H].set(vec2(p1p, p1e, "beta"))
    v = v.at[_V_BLIN1, 0:k1].set(p1p["b_lin"][0])
    v = v.at[_V_BCONV2, 0:2 * H].set(vec2(p2p, p2e, "b_rel"))
    v = v.at[_V_GAMMA2, 0:2 * H].set(vec2(p2p, p2e, "gamma"))
    v = v.at[_V_BETA2, 0:2 * H].set(vec2(p2p, p2e, "beta"))
    v = v.at[_V_BLIN2, 0:k2].set(p2p["b_lin"][0])
    v = v.at[_V_BCONV3, 0:H].set(p3["b_rel"][0])
    v = v.at[_V_GAMMA3, 0:H].set(p3["gamma"][0])
    v = v.at[_V_BETA3, 0:H].set(p3["beta"][0])

    # Packed readout head: columns [0:feat) = lin, column feat = value head.
    # Columns >= feat+1 must stay exactly zero (loss lanes added in-kernel).
    w_head = jnp.zeros((wpad, pack), jnp.float32)
    w_head = w_head.at[0:H, 0:feat].set(params["w_z"])
    w_head = w_head.at[0:H, feat:feat + 1].set(params["w_v"])
    b_head = jnp.zeros((1, pack), jnp.float32)
    b_head = b_head.at[:, 0:feat].set(params["b_z"])
    b_head = b_head.at[:, feat:feat + 1].set(params["b_v"])
    return dict(w_slab=w_slab, v_slab=v, w_head=w_head, b_head=b_head)


def init_manager(key, hidden_dim, feat_dim):
    ks = jax.random.split(key, 7)
    params = {
        "gnn1_pool": init_g_sage(ks[0], hidden_dim, hidden_dim, 80, lin=True),
        "gnn1_embed": init_g_sage(ks[1], hidden_dim, hidden_dim, hidden_dim, lin=False),
        "gnn2_pool": init_g_sage(ks[2], hidden_dim, hidden_dim, 20, lin=True),
        "gnn2_embed": init_g_sage(ks[3], hidden_dim, hidden_dim, hidden_dim, lin=False),
        "gnn3_embed": init_g_sage(ks[4], hidden_dim, hidden_dim, hidden_dim, lin=False),
    }
    params["w_z"], params["b_z"] = _init_linear(ks[5], hidden_dim, feat_dim)
    kvw, kvb = jax.random.split(ks[6])
    sv = 1.0 / math.sqrt(hidden_dim)
    params["w_v"] = jax.random.uniform(kvw, (hidden_dim, 1), jnp.float32, -sv, sv)
    params["b_v"] = jax.random.uniform(kvb, (1, 1), jnp.float32, -sv, sv)
    params.update(_build_packed(params, hidden_dim, feat_dim))
    return params


# --------------------- pure-JAX f32 reference (for checking) -----------------

def _sage_ref(p, x, adj, lin):
    x0 = jnp.maximum(x, 0.0)
    deg = jnp.maximum(jnp.sum(adj, axis=-1, keepdims=True), 1.0)
    msg = (adj @ x0) / deg
    x1 = jnp.maximum(msg @ p["w_rel"] + p["b_rel"] + x0 @ p["w_root"], 0.0)
    if x.shape[0] > 1:
        mean = jnp.mean(x1, axis=0, keepdims=True)
        var = jnp.mean((x1 - mean) ** 2, axis=0, keepdims=True)
        x1 = (x1 - mean) / jnp.sqrt(var + 1e-5) * p["gamma"] + p["beta"]
    if lin:
        x1 = jnp.maximum(x1 @ p["w_lin"] + p["b_lin"], 0.0)
    return x1


def _diff_pool_ref(y, adj, logits):
    s = jax.nn.softmax(logits, axis=-1)
    out = s.T @ y
    out_adj = s.T @ adj @ s
    link = jnp.sqrt(jnp.sum((adj - s @ s.T) ** 2)) / (adj.shape[0] * adj.shape[1])
    ent = jnp.mean(jnp.sum(-s * jnp.log(s + 1e-15), axis=-1))
    return out, out_adj, link, ent


def manager_reference(params, h, adj):
    n = h.shape[0]
    x, a = h, adj
    l = e = jnp.float32(0.0)
    if n >= 100:
        s = _sage_ref(params["gnn1_pool"], x, a, True)
        y = _sage_ref(params["gnn1_embed"], x, a, False)
        x, a, l1, e1 = _diff_pool_ref(y, a, s)
        s = _sage_ref(params["gnn2_pool"], x, a, True)
        y = _sage_ref(params["gnn2_embed"], x, a, False)
        x, a, l2, e2 = _diff_pool_ref(y, a, s)
        l, e = l1 + l2, e1 + e2
    elif n >= 25:
        s = _sage_ref(params["gnn2_pool"], x, a, True)
        y = _sage_ref(params["gnn2_embed"], x, a, False)
        x, a, l, e = _diff_pool_ref(y, a, s)
    y = _sage_ref(params["gnn3_embed"], x, a, False)
    ym = jnp.mean(y, axis=0, keepdims=True)
    z = ym @ params["w_z"] + params["b_z"]
    value = ym @ params["w_v"] + params["b_v"]
    return value, z, l, e


# ---------------------------------- main --------------------------------------

if __name__ == "__main__":
    HIDDEN, FEAT, N = 32, 8, 32   # 25 <= N < 100 -> gnn2 pool/embed + diff-pool
    key = jax.random.PRNGKey(0)
    kp, kh, ka = jax.random.split(key, 3)

    params = init_manager(kp, HIDDEN, FEAT)
    h = jax.random.normal(kh, (N, HIDDEN), jnp.float32)
    adj = (jax.random.uniform(ka, (N, N)) > 0.5).astype(jnp.float32)
    adj = jnp.maximum(adj, adj.T)                          # symmetric adjacency
    adj = adj.at[jnp.arange(N), jnp.arange(N)].set(1.0)    # self loops

    fwd = jax.jit(lambda p, x, a: manager_forward(p, x, a, mask=None))
    value, z, l, e = fwd(params, h, adj)
    jax.block_until_ready((value, z, l, e))

    assert value.shape == (1, 1)
    assert z.shape == (1, FEAT)
    assert l.shape == () and e.shape == ()

    # Loose-tolerance check against a pure-JAX f32 reference (the kernel feeds
    # the MXU with bf16 operands, so exact equality is not expected).
    value_r, z_r, l_r, e_r = manager_reference(params, h, adj)
    np.testing.assert_allclose(np.asarray(value), np.asarray(value_r),
                               rtol=5e-2, atol=5e-2)
    np.testing.assert_allclose(np.asarray(z), np.asarray(z_r),
                               rtol=5e-2, atol=5e-2)
    np.testing.assert_allclose(np.asarray(l), np.asarray(l_r),
                               rtol=5e-2, atol=5e-2)
    np.testing.assert_allclose(np.asarray(e), np.asarray(e_r),
                               rtol=5e-2, atol=5e-2)
    print("KERNEL_OK")
</pallas_src>

<mosaic_0001>
module attributes {stable_mosaic.version = 11 : i64} {
  func.func @_fused_forward_kernel(%arg0: memref<32x32xf32, #tpu.memory_space<vmem>>, %arg1: memref<32x32xbf16, #tpu.memory_space<vmem>>, %arg2: memref<32x1xf32, #tpu.memory_space<vmem>>, %arg3: memref<1x1xf32, #tpu.memory_space<smem>>, %arg4: memref<256x128xbf16, #tpu.memory_space<vmem>>, %arg5: memref<16x128xf32, #tpu.memory_space<vmem>>, %arg6: memref<128x128xf32, #tpu.memory_space<vmem>>, %arg7: memref<1x128xf32, #tpu.memory_space<vmem>>, %arg8: memref<1x128xf32, #tpu.memory_space<vmem>>) attributes {dimension_semantics = [], scalar_prefetch = 0 : i64, scratch_operands = 0 : i64, tpu.core_type = #tpu.core_type<tc>} {
    %c0 = arith.constant 0 : index
    %c0_0 = arith.constant 0 : index
    %0 = vector.load %arg0[%c0, %c0_0] : memref<32x32xf32, #tpu.memory_space<vmem>>, vector<32x32xf32>
    %c0_1 = arith.constant 0 : index
    %c0_2 = arith.constant 0 : index
    %1 = vector.load %arg1[%c0_1, %c0_2] : memref<32x32xbf16, #tpu.memory_space<vmem>>, vector<32x32xbf16>
    %c0_3 = arith.constant 0 : index
    %c0_4 = arith.constant 0 : index
    %2 = vector.load %arg2[%c0_3, %c0_4] : memref<32x1xf32, #tpu.memory_space<vmem>>, vector<32x1xf32>
    %c0_5 = arith.constant 0 : index
    %c0_6 = arith.constant 0 : index
    %3 = memref.load %arg3[%c0_5, %c0_6] : memref<1x1xf32, #tpu.memory_space<smem>>
    %cst = arith.constant 0.000000e+00 : f32
    %4 = vector.broadcast %cst : f32 to vector<32x32xf32>
    %5 = arith.maximumf %0, %4 : vector<32x32xf32>
    %6 = arith.truncf %5 : vector<32x32xf32> to vector<32x32xbf16>
    %cst_7 = arith.constant dense<0.000000e+00> : vector<32x32xf32>
    %7 = tpu.matmul %1, %6, %cst_7 {dimension_numbers = #tpu.dot_dimension_numbers<[1], [0], [0], [1], [0, 0, 1, 1], [], []>} : vector<32x32xbf16>, vector<32x32xbf16>, vector<32x32xf32> -> vector<32x32xf32>
    %8 = vector.broadcast %2 : vector<32x1xf32> to vector<32x32xf32>
    %9 = arith.mulf %7, %8 : vector<32x32xf32>
    %10 = arith.truncf %9 : vector<32x32xf32> to vector<32x32xbf16>
    %c96 = arith.constant 96 : index
    %c0_8 = arith.constant 0 : index
    %11 = vector.load %arg4[%c96, %c0_8] : memref<256x128xbf16, #tpu.memory_space<vmem>>, vector<32x128xbf16>
    %c128 = arith.constant 128 : index
    %c0_9 = arith.constant 0 : index
    %12 = vector.load %arg4[%c128, %c0_9] : memref<256x128xbf16, #tpu.memory_space<vmem>>, vector<32x128xbf16>
    %cst_10 = arith.constant dense<0.000000e+00> : vector<32x128xf32>
    %13 = tpu.matmul %10, %11, %cst_10 {dimension_numbers = #tpu.dot_dimension_numbers<[1], [0], [0], [1], [0, 0, 1, 1], [], []>} : vector<32x32xbf16>, vector<32x128xbf16>, vector<32x128xf32> -> vector<32x128xf32>
    %cst_11 = arith.constant dense<0.000000e+00> : vector<32x128xf32>
    %14 = tpu.matmul %6, %12, %cst_11 {dimension_numbers = #tpu.dot_dimension_numbers<[1], [0], [0], [1], [0, 0, 1, 1], [], []>} : vector<32x32xbf16>, vector<32x128xbf16>, vector<32x128xf32> -> vector<32x128xf32>
    %15 = arith.addf %13, %14 : vector<32x128xf32>
    %c4 = arith.constant 4 : index
    %c0_12 = arith.constant 0 : index
    %16 = vector.load %arg5[%c4, %c0_12] : memref<16x128xf32, #tpu.memory_space<vmem>>, vector<1x128xf32>
    %17 = vector.broadcast %16 : vector<1x128xf32> to vector<32x128xf32>
    %18 = arith.addf %15, %17 : vector<32x128xf32>
    %cst_13 = arith.constant 0.000000e+00 : f32
    %19 = vector.broadcast %cst_13 : f32 to vector<32x128xf32>
    %20 = arith.maximumf %18, %19 : vector<32x128xf32>
    %c5 = arith.constant 5 : index
    %c0_14 = arith.constant 0 : index
    %21 = vector.load %arg5[%c5, %c0_14] : memref<16x128xf32, #tpu.memory_space<vmem>>, vector<1x128xf32>
    %c6 = arith.constant 6 : index
    %c0_15 = arith.constant 0 : index
    %22 = vector.load %arg5[%c6, %c0_15] : memref<16x128xf32, #tpu.memory_space<vmem>>, vector<1x128xf32>
    %cst_16 = arith.constant dense<0.000000e+00> : vector<128xf32>
    %23 = vector.multi_reduction <add>, %20, %cst_16 [0] : vector<32x128xf32> to vector<128xf32>
    %24 = vector.shape_cast %23 : vector<128xf32> to vector<1x128xf32>
    %cst_17 = arith.constant 3.200000e+01 : f32
    %25 = vector.broadcast %cst_17 : f32 to vector<1x128xf32>
    %26 = arith.divf %24, %25 : vector<1x128xf32>
    %27 = vector.broadcast %26 : vector<1x128xf32> to vector<32x128xf32>
    %28 = arith.subf %20, %27 : vector<32x128xf32>
    %29 = vector.broadcast %26 : vector<1x128xf32> to vector<32x128xf32>
    %30 = arith.subf %20, %29 : vector<32x128xf32>
    %31 = arith.mulf %28, %30 : vector<32x128xf32>
    %cst_18 = arith.constant dense<0.000000e+00> : vector<128xf32>
    %32 = vector.multi_reduction <add>, %31, %cst_18 [0] : vector<32x128xf32> to vector<128xf32>
    %33 = vector.shape_cast %32 : vector<128xf32> to vector<1x128xf32>
    %cst_19 = arith.constant 3.200000e+01 : f32
    %34 = vector.broadcast %cst_19 : f32 to vector<1x128xf32>
    %35 = arith.divf %33, %34 : vector<1x128xf32>
    %36 = vector.broadcast %26 : vector<1x128xf32> to vector<32x128xf32>
    %37 = arith.subf %20, %36 : vector<32x128xf32>
    %cst_20 = arith.constant 9.99999974E-6 : f32
    %38 = vector.broadcast %cst_20 : f32 to vector<1x128xf32>
    %39 = arith.addf %35, %38 : vector<1x128xf32>
    %40 = math.rsqrt %39 : vector<1x128xf32>
    %41 = vector.broadcast %40 : vector<1x128xf32> to vector<32x128xf32>
    %42 = arith.mulf %37, %41 : vector<32x128xf32>
    %43 = vector.broadcast %21 : vector<1x128xf32> to vector<32x128xf32>
    %44 = arith.mulf %42, %43 : vector<32x128xf32>
    %45 = vector.broadcast %22 : vector<1x128xf32> to vector<32x128xf32>
    %46 = arith.addf %44, %45 : vector<32x128xf32>
    %47 = vector.extract_strided_slice %46 {offsets = [0, 0], sizes = [32, 32], strides = [1, 1]} : vector<32x128xf32> to vector<32x32xf32>
    %48 = vector.extract_strided_slice %46 {offsets = [0, 32], sizes = [32, 32], strides = [1, 1]} : vector<32x128xf32> to vector<32x32xf32>
    %c160 = arith.constant 160 : index
    %c0_21 = arith.constant 0 : index
    %49 = vector.load %arg4[%c160, %c0_21] : memref<256x128xbf16, #tpu.memory_space<vmem>>, vector<32x128xbf16>
    %50 = arith.truncf %47 : vector<32x32xf32> to vector<32x32xbf16>
    %cst_22 = arith.constant dense<0.000000e+00> : vector<32x128xf32>
    %51 = tpu.matmul %50, %49, %cst_22 {dimension_numbers = #tpu.dot_dimension_numbers<[1], [0], [0], [1], [0, 0, 1, 1], [], []>} : vector<32x32xbf16>, vector<32x128xbf16>, vector<32x128xf32> -> vector<32x128xf32>
    %c7 = arith.constant 7 : index
    %c0_23 = arith.constant 0 : index
    %52 = vector.load %arg5[%c7, %c0_23] : memref<16x128xf32, #tpu.memory_space<vmem>>, vector<1x128xf32>
    %53 = vector.broadcast %52 : vector<1x128xf32> to vector<32x128xf32>
    %54 = arith.addf %51, %53 : vector<32x128xf32>
    %cst_24 = arith.constant 0.000000e+00 : f32
    %55 = vector.broadcast %cst_24 : f32 to vector<32x128xf32>
    %56 = arith.maximumf %54, %55 : vector<32x128xf32>
    %57 = vector.extract_strided_slice %56 {offsets = [0, 0], sizes = [32, 20], strides = [1, 1]} : vector<32x128xf32> to vector<32x20xf32>
    %cst_25 = arith.constant dense<0xFF800000> : vector<32xf32>
    %58 = vector.multi_reduction <maximumf>, %57, %cst_25 [1] : vector<32x20xf32> to vector<32xf32>
    %59 = vector.shape_cast %58 : vector<32xf32> to vector<32x1xf32>
    %60 = vector.broadcast %59 : vector<32x1xf32> to vector<32x20xf32>
    %61 = arith.subf %57, %60 : vector<32x20xf32>
    %62 = math.exp %61 : vector<32x20xf32>
    %cst_26 = arith.constant dense<0.000000e+00> : vector<32xf32>
    %63 = vector.multi_reduction <add>, %62, %cst_26 [1] : vector<32x20xf32> to vector<32xf32>
    %64 = vector.shape_cast %63 : vector<32xf32> to vector<32x1xf32>
    %65 = tpu.reciprocal %64 {approx = true} : vector<32x1xf32> -> vector<32x1xf32>
    %66 = vector.broadcast %65 : vector<32x1xf32> to vector<32x20xf32>
    %67 = arith.mulf %62, %66 : vector<32x20xf32>
    %68 = arith.truncf %67 : vector<32x20xf32> to vector<32x20xbf16>
    %69 = arith.truncf %48 : vector<32x32xf32> to vector<32x32xbf16>
    %cst_27 = arith.constant dense<0.000000e+00> : vector<20x32xf32>
    %70 = tpu.matmul %68, %69, %cst_27 {dimension_numbers = #tpu.dot_dimension_numbers<[0], [0], [1], [1], [0, 1, 1, 1], [], []>} : vector<32x20xbf16>, vector<32x32xbf16>, vector<20x32xf32> -> vector<20x32xf32>
    %cst_28 = arith.constant dense<0.000000e+00> : vector<20x32xf32>
    %71 = tpu.matmul %68, %1, %cst_28 {dimension_numbers = #tpu.dot_dimension_numbers<[0], [0], [1], [1], [0, 1, 1, 1], [], []>} : vector<32x20xbf16>, vector<32x32xbf16>, vector<20x32xf32> -> vector<20x32xf32>
    %72 = arith.truncf %71 : vector<20x32xf32> to vector<20x32xbf16>
    %cst_29 = arith.constant dense<0.000000e+00> : vector<20x20xf32>
    %73 = tpu.matmul %72, %68, %cst_29 {dimension_numbers = #tpu.dot_dimension_numbers<[1], [0], [0], [1], [0, 0, 1, 1], [], []>} : vector<20x32xbf16>, vector<32x20xbf16>, vector<20x20xf32> -> vector<20x20xf32>
    %cst_30 = arith.constant dense<0.000000e+00> : vector<20x20xf32>
    %74 = tpu.matmul %68, %68, %cst_30 {dimension_numbers = #tpu.dot_dimension_numbers<[0], [0], [1], [1], [0, 1, 1, 1], [], []>} : vector<32x20xbf16>, vector<32x20xbf16>, vector<20x20xf32> -> vector<20x20xf32>
    %75 = tpu.iota {dimensions = array<i32: 0>} : vector<20x20xi32>
    %76 = tpu.iota {dimensions = array<i32: 1>} : vector<20x20xi32>
    %77 = arith.cmpi eq, %75, %76 : vector<20x20xi32>
    %cst_31 = arith.constant 0.000000e+00 : f32
    %78 = vector.broadcast %cst_31 : f32 to vector<20x20xf32>
    %79 = arith.select %77, %73, %78 : vector<20x20xi1>, vector<20x20xf32>
    %cst_32 = arith.constant dense<0.000000e+00> : vector<20xf32>
    %80 = vector.multi_reduction <add>, %79, %cst_32 [1] : vector<20x20xf32> to vector<20xf32>
    %81 = vector.shape_cast %80 : vector<20xf32> to vector<20x1xf32>
    %cst_33 = arith.constant dense<0.000000e+00> : vector<1xf32>
    %82 = vector.multi_reduction <add>, %81, %cst_33 [0] : vector<20x1xf32> to vector<1xf32>
    %83 = vector.shape_cast %82 : vector<1xf32> to vector<1x1xf32>
    %84 = arith.mulf %74, %74 : vector<20x20xf32>
    %cst_34 = arith.constant dense<0.000000e+00> : vector<20xf32>
    %85 = vector.multi_reduction <add>, %84, %cst_34 [1] : vector<20x20xf32> to vector<20xf32>
    %86 = vector.shape_cast %85 : vector<20xf32> to vector<20x1xf32>
    %cst_35 = arith.constant dense<0.000000e+00> : vector<1xf32>
    %87 = vector.multi_reduction <add>, %86, %cst_35 [0] : vector<20x1xf32> to vector<1xf32>
    %88 = vector.shape_cast %87 : vector<1xf32> to vector<1x1xf32>
    %cst_36 = arith.constant 2.000000e+00 : f32
    %89 = vector.broadcast %cst_36 : f32 to vector<1x1xf32>
    %90 = arith.mulf %89, %83 : vector<1x1xf32>
    %91 = vector.broadcast %3 : f32 to vector<1x1xf32>
    %92 = arith.subf %91, %90 : vector<1x1xf32>
    %93 = arith.addf %92, %88 : vector<1x1xf32>
    %cst_37 = arith.constant 0.000000e+00 : f32
    %94 = vector.broadcast %cst_37 : f32 to vector<1x1xf32>
    %95 = arith.maximumf %93, %94 : vector<1x1xf32>
    %96 = math.sqrt %95 : vector<1x1xf32>
    %cst_38 = arith.constant 9.765625E-4 : f32
    %97 = vector.broadcast %cst_38 : f32 to vector<1x1xf32>
    %98 = arith.mulf %96, %97 : vector<1x1xf32>
    %cst_39 = arith.constant 0.000000e+00 : f32
    %99 = vector.broadcast %cst_39 : f32 to vector<32x20xf32>
    %100 = arith.subf %99, %67 : vector<32x20xf32>
    %cst_40 = arith.constant 1.000000e-15 : f32
    %101 = vector.broadcast %cst_40 : f32 to vector<32x20xf32>
    %102 = arith.addf %67, %101 : vector<32x20xf32>
    %103 = math.log %102 : vector<32x20xf32>
    %104 = arith.mulf %100, %103 : vector<32x20xf32>
    %cst_41 = arith.constant dense<0.000000e+00> : vector<32xf32>
    %105 = vector.multi_reduction <add>, %104, %cst_41 [1] : vector<32x20xf32> to vector<32xf32>
    %106 = vector.shape_cast %105 : vector<32xf32> to vector<32x1xf32>
    %cst_42 = arith.constant dense<0.000000e+00> : vector<1xf32>
    %107 = vector.multi_reduction <add>, %106, %cst_42 [0] : vector<32x1xf32> to vector<1xf32>
    %108 = vector.shape_cast %107 : vector<1xf32> to vector<1x1xf32>
    %cst_43 = arith.constant 3.125000e-02 : f32
    %109 = vector.broadcast %cst_43 : f32 to vector<1x1xf32>
    %110 = arith.mulf %108, %109 : vector<1x1xf32>
    %cst_44 = arith.constant dense<0.000000e+00> : vector<20xf32>
    %111 = vector.multi_reduction <add>, %73, %cst_44 [1] : vector<20x20xf32> to vector<20xf32>
    %112 = vector.shape_cast %111 : vector<20xf32> to vector<20x1xf32>
    %cst_45 = arith.constant 1.000000e+00 : f32
    %113 = vector.broadcast %cst_45 : f32 to vector<20x1xf32>
    %114 = arith.maximumf %112, %113 : vector<20x1xf32>
    %115 = tpu.reciprocal %114 {approx = true} : vector<20x1xf32> -> vector<20x1xf32>
    %116 = arith.truncf %73 : vector<20x20xf32> to vector<20x20xbf16>
    %cst_46 = arith.constant 0.000000e+00 : f32
    %117 = vector.broadcast %cst_46 : f32 to vector<20x32xf32>
    %118 = arith.maximumf %70, %117 : vector<20x32xf32>
    %119 = arith.truncf %118 : vector<20x32xf32> to vector<20x32xbf16>
    %cst_47 = arith.constant dense<0.000000e+00> : vector<20x32xf32>
    %120 = tpu.matmul %116, %119, %cst_47 {dimension_numbers = #tpu.dot_dimension_numbers<[1], [0], [0], [1], [0, 0, 1, 1], [], []>} : vector<20x20xbf16>, vector<20x32xbf16>, vector<20x32xf32> -> vector<20x32xf32>
    %121 = vector.broadcast %115 : vector<20x1xf32> to vector<20x32xf32>
    %122 = arith.mulf %120, %121 : vector<20x32xf32>
    %123 = arith.truncf %122 : vector<20x32xf32> to vector<20x32xbf16>
    %c192 = arith.constant 192 : index
    %c0_48 = arith.constant 0 : index
    %124 = vector.load %arg4[%c192, %c0_48] : memref<256x128xbf16, #tpu.memory_space<vmem>>, vector<32x128xbf16>
    %c224 = arith.constant 224 : index
    %c0_49 = arith.constant 0 : index
    %125 = vector.load %arg4[%c224, %c0_49] : memref<256x128xbf16, #tpu.memory_space<vmem>>, vector<32x128xbf16>
    %cst_50 = arith.constant dense<0.000000e+00> : vector<20x128xf32>
    %126 = tpu.matmul %123, %124, %cst_50 {dimension_numbers = #tpu.dot_dimension_numbers<[1], [0], [0], [1], [0, 0, 1, 1], [], []>} : vector<20x32xbf16>, vector<32x128xbf16>, vector<20x128xf32> -> vector<20x128xf32>
    %cst_51 = arith.constant dense<0.000000e+00> : vector<20x128xf32>
    %127 = tpu.matmul %119, %125, %cst_51 {dimension_numbers = #tpu.dot_dimension_numbers<[1], [0], [0], [1], [0, 0, 1, 1], [], []>} : vector<20x32xbf16>, vector<32x128xbf16>, vector<20x128xf32> -> vector<20x128xf32>
    %128 = arith.addf %126, %127 : vector<20x128xf32>
    %c8 = arith.constant 8 : index
    %c0_52 = arith.constant 0 : index
    %129 = vector.load %arg5[%c8, %c0_52] : memref<16x128xf32, #tpu.memory_space<vmem>>, vector<1x128xf32>
    %130 = vector.broadcast %129 : vector<1x128xf32> to vector<20x128xf32>
    %131 = arith.addf %128, %130 : vector<20x128xf32>
    %cst_53 = arith.constant 0.000000e+00 : f32
    %132 = vector.broadcast %cst_53 : f32 to vector<20x128xf32>
    %133 = arith.maximumf %131, %132 : vector<20x128xf32>
    %c9 = arith.constant 9 : index
    %c0_54 = arith.constant 0 : index
    %134 = vector.load %arg5[%c9, %c0_54] : memref<16x128xf32, #tpu.memory_space<vmem>>, vector<1x128xf32>
    %c10 = arith.constant 10 : index
    %c0_55 = arith.constant 0 : index
    %135 = vector.load %arg5[%c10, %c0_55] : memref<16x128xf32, #tpu.memory_space<vmem>>, vector<1x128xf32>
    %cst_56 = arith.constant dense<0.000000e+00> : vector<128xf32>
    %136 = vector.multi_reduction <add>, %133, %cst_56 [0] : vector<20x128xf32> to vector<128xf32>
    %137 = vector.shape_cast %136 : vector<128xf32> to vector<1x128xf32>
    %cst_57 = arith.constant 2.000000e+01 : f32
    %138 = vector.broadcast %cst_57 : f32 to vector<1x128xf32>
    %139 = arith.divf %137, %138 : vector<1x128xf32>
    %140 = vector.broadcast %139 : vector<1x128xf32> to vector<20x128xf32>
    %141 = arith.subf %133, %140 : vector<20x128xf32>
    %142 = vector.broadcast %139 : vector<1x128xf32> to vector<20x128xf32>
    %143 = arith.subf %133, %142 : vector<20x128xf32>
    %144 = arith.mulf %141, %143 : vector<20x128xf32>
    %cst_58 = arith.constant dense<0.000000e+00> : vector<128xf32>
    %145 = vector.multi_reduction <add>, %144, %cst_58 [0] : vector<20x128xf32> to vector<128xf32>
    %146 = vector.shape_cast %145 : vector<128xf32> to vector<1x128xf32>
    %cst_59 = arith.constant 2.000000e+01 : f32
    %147 = vector.broadcast %cst_59 : f32 to vector<1x128xf32>
    %148 = arith.divf %146, %147 : vector<1x128xf32>
    %149 = vector.broadcast %139 : vector<1x128xf32> to vector<20x128xf32>
    %150 = arith.subf %133, %149 : vector<20x128xf32>
    %cst_60 = arith.constant 9.99999974E-6 : f32
    %151 = vector.broadcast %cst_60 : f32 to vector<1x128xf32>
    %152 = arith.addf %148, %151 : vector<1x128xf32>
    %153 = math.rsqrt %152 : vector<1x128xf32>
    %154 = vector.broadcast %153 : vector<1x128xf32> to vector<20x128xf32>
    %155 = arith.mulf %150, %154 : vector<20x128xf32>
    %156 = vector.broadcast %134 : vector<1x128xf32> to vector<20x128xf32>
    %157 = arith.mulf %155, %156 : vector<20x128xf32>
    %158 = vector.broadcast %135 : vector<1x128xf32> to vector<20x128xf32>
    %159 = arith.addf %157, %158 : vector<20x128xf32>
    %cst_61 = arith.constant dense<0.000000e+00> : vector<128xf32>
    %160 = vector.multi_reduction <add>, %159, %cst_61 [0] : vector<20x128xf32> to vector<128xf32>
    %161 = vector.shape_cast %160 : vector<128xf32> to vector<1x128xf32>
    %cst_62 = arith.constant 2.000000e+01 : f32
    %162 = vector.broadcast %cst_62 : f32 to vector<1x128xf32>
    %163 = arith.divf %161, %162 : vector<1x128xf32>
    %c0_63 = arith.constant 0 : index
    %c0_64 = arith.constant 0 : index
    %164 = vector.load %arg6[%c0_63, %c0_64] : memref<128x128xf32, #tpu.memory_space<vmem>>, vector<128x128xf32>
    %cst_65 = arith.constant dense<0.000000e+00> : vector<1x128xf32>
    %165 = tpu.matmul %163, %164, %cst_65 {dimension_numbers = #tpu.dot_dimension_numbers<[1], [0], [0], [1], [0, 0, 1, 1], [], []>} : vector<1x128xf32>, vector<128x128xf32>, vector<1x128xf32> -> vector<1x128xf32>
    %c0_66 = arith.constant 0 : index
    %c0_67 = arith.constant 0 : index
    %166 = vector.load %arg7[%c0_66, %c0_67] : memref<1x128xf32, #tpu.memory_space<vmem>>, vector<1x128xf32>
    %167 = arith.addf %165, %166 : vector<1x128xf32>
    %168 = tpu.iota {dimensions = array<i32: 1>} : vector<1x128xi32>
    %c9_i32 = arith.constant 9 : i32
    %169 = vector.broadcast %c9_i32 : i32 to vector<1x128xi32>
    %170 = arith.cmpi eq, %168, %169 : vector<1x128xi32>
    %cst_68 = arith.constant 0.000000e+00 : f32
    %171 = vector.shape_cast %98 : vector<1x1xf32> to vector<1x1xf32>
    %172 = vector.broadcast %171 : vector<1x1xf32> to vector<1x128xf32>
    %173 = vector.broadcast %cst_68 : f32 to vector<1x128xf32>
    %174 = arith.select %170, %172, %173 : vector<1x128xi1>, vector<1x128xf32>
    %175 = arith.addf %167, %174 : vector<1x128xf32>
    %c10_i32 = arith.constant 10 : i32
    %176 = vector.broadcast %c10_i32 : i32 to vector<1x128xi32>
    %177 = arith.cmpi eq, %168, %176 : vector<1x128xi32>
    %cst_69 = arith.constant 0.000000e+00 : f32
    %178 = vector.shape_cast %110 : vector<1x1xf32> to vector<1x1xf32>
    %179 = vector.broadcast %178 : vector<1x1xf32> to vector<1x128xf32>
    %180 = vector.broadcast %cst_69 : f32 to vector<1x128xf32>
    %181 = arith.select %177, %179, %180 : vector<1x128xi1>, vector<1x128xf32>
    %182 = arith.addf %175, %181 : vector<1x128xf32>
    %c0_70 = arith.constant 0 : index
    %c0_71 = arith.constant 0 : index
    %183 = vector.load %arg8[%c0_70, %c0_71] : memref<1x128xf32, #tpu.memory_space<vmem>>, vector<1x128xf32>
    tpu.vector_store %arg8[%c0_70, %c0_71], %182 {strides = array<i32>} : memref<1x128xf32, #tpu.memory_space<vmem>>, vector<1x128xf32>,
    return
  }
}

</mosaic_0001>

<bundles_post_ra>
// kernel: _lambda_.1
= control target key start
LH: loop header
LB: loop body
LE: loop exit
PB: predicated region body
PF: predicated region fallthrough
CT: control target
= control target key end

     0   :  { %14 = vsyncpa [#allocation4], 0  ;;  %s1827_s0 = inlined_call_operand.vmem [shape: f32[32,32], index: 0, kind: input, shape index: {}]   ;;  %s1828_s1 = inlined_call_operand.vmem [shape: bf16[32,32], index: 1, kind: input, shape index: {}]   ;;  %s1829_s2 = inlined_call_operand.vmem [shape: f32[32,1], index: 2, kind: input, shape index: {}]   ;;  %s1830_s3 = inlined_call_operand.<no memory space> [shape: f32[1,1], index: 3, kind: input, shape index: {}]   ;;  %s1831_s4 = inlined_call_operand.hbm [shape: bf16[256,128], index: 4, kind: input, shape index: {}]   ;;  %s1832_s5 = inlined_call_operand.vmem [shape: f32[16,128], index: 5, kind: input, shape index: {}]   ;;  %s1833_s6 = inlined_call_operand.hbm [shape: f32[128,128], index: 6, kind: input, shape index: {}]   ;;  %s1834_s7 = inlined_call_operand.vmem [shape: f32[1,128], index: 7, kind: input, shape index: {}]   ;;  %s1835_s8 = inlined_call_operand.vmem [shape: f32[1,128], index: 8, kind: output, shape index: {}]  }
   0x1   :  { %15 = vsyncpa [#allocation6], 0  ;;  %s1603_s27 = smov [#allocation3]   ;;  %s1555_s9 = scalar_lea.hbm %s1831_s4, 2048 }
   0x2   :  { %s29_s28 = sshll.u32 %s1603_s27, 4  ;;  %p1556_p0 = scmp.ne.s32.totalorder %s1831_s4, %s1555_s9  ;;  %s30_s28 = int_to_ptr.vmem [resolvable:$true] %s29_s28 }
   0x3   :  { %p1559_p1 = scmp.lt.u32.totalorder %s1555_s9, %s1831_s4 }
   0x5   :  { %p1561_p2 = pnand %p1559_p1, %p1556_p0 }
   0x7   :  { %1564 = shalt.err (!%p1561_p2)
}
   0x8   :  { %s1565_s14 = scalar_lea.vmem %s30_s28, 2048  ;;  %p1570_p4 = scmp.lt.s32.totalorder %s30_s28, %s30_s28 }
   0x9   :  { %p1566_p3 = scmp.ne.s32.totalorder %s30_s28, %s1565_s14  ;;  %p1571_p5 = scmp.lt.s32.totalorder %s1565_s14, %s1565_s14 }
   0xb   :  { %p1572_p6 = por %p1571_p5, %p1570_p4 }
   0xd   :  { %p1573_p7 = pnand %p1572_p6, %p1566_p3 }
   0xf   :  { %1576 = shalt.err (!%p1573_p7)
}
  0x10   :  { %s1604_s15 = smov 64   ;;  %s1605_s16 = smov 4  }
  0x11   :  { %35 = dma.hbm_to_vmem [thread:$0]  %s1831_s4, 2048, %s30_s28, [#allocation4], %s1604_s15, %s1604_s15, %s1605_s16  }
  0x12   :  { %s1606_s19 = smov [#allocation5]   ;;  %s1577_s23 = scalar_lea.hbm %s1833_s6, 2048 }
  0x13   :  { %s43_s20 = sshll.u32 %s1606_s19, 4  ;;  %p1578_p8 = scmp.ne.s32.totalorder %s1833_s6, %s1577_s23  ;;  %s44_s20 = int_to_ptr.vmem [resolvable:$true] %s43_s20 }
  0x14   :  { %p1581_p9 = scmp.lt.u32.totalorder %s1577_s23, %s1833_s6 }
  0x16   :  { %p1583_p10 = pnand %p1581_p9, %p1578_p8 }
  0x18   :  { %1586 = shalt.err (!%p1583_p10)
}
  0x19   :  { %s1587_s29 = scalar_lea.vmem %s44_s20, 2048  ;;  %p1592_p12 = scmp.lt.s32.totalorder %s44_s20, %s44_s20 }
  0x1a   :  { %p1588_p11 = scmp.ne.s32.totalorder %s44_s20, %s1587_s29  ;;  %p1593_p13 = scmp.lt.s32.totalorder %s1587_s29, %s1587_s29 }
  0x1c   :  { %p1594_p0 = por %p1593_p13, %p1592_p12 }
  0x1e   :  { %p1595_p1 = pnand %p1594_p0, %p1588_p11 }
  0x20   :  { %1598 = shalt.err (!%p1595_p1)
}
  0x21   :  { %s1607_s4 = smov 128   ;;  %s1608_s28 = smov 8  }
  0x22   :  { %49 = dma.hbm_to_vmem [thread:$0]  %s1833_s6, 2048, %s44_s20, [#allocation6], %s1607_s4, %s1607_s4, %s1608_s28  }
  0x23   :  { %1599 = dma.done.wait [#allocation4], 2048  }
  0x24   :  { %1600 = vsyncadd [#allocation4], 4294965248 }
  0x25   :  { %1601 = dma.done.wait [#allocation6], 2048  }
  0x26   :  { %1602 = vsyncadd [#allocation6], 4294965248  ;;  %v1609_v0 = vmov 0   ;;  %v59_v1 = vld [vmem:[%s1827_s0] sm:$0xff]  ;;  %v60_v2 = vld [vmem:[%s1827_s0 + $0x8] sm:$0xff]  ;;  %vm88_vm0 = vcmask 261120  }
  0x27   :  { %1505 = vset.pattern.permute.xlu0 %v1609_v0  ;;  %1506 = vset.pattern.permute.xlu1 %v1609_v0  ;;  %v61_v3 = vld [vmem:[%s1827_s0 + $0x10] sm:$0xff]  ;;  %v72_v4 = vmax.f32 %v59_v1, 0.0  ;;  %v73_v5 = vmax.f32 %v60_v2, 0.0  ;;  %v62_v6 = vld [vmem:[%s1827_s0 + $0x18] sm:$0xff]  ;;  %v1507_v9 = vld [vmem:[%s1828_s1] sm:$0xff]   ;;  %vm460_vm1 = vcmask 162816  }
  0x28   :  { %v74_v7 = vmax.f32 %v61_v3, 0.0  ;;  %v75_v8 = vmax.f32 %v62_v6, 0.0  ;;  %v67_v11 = vld [vmem:[%s1829_s2] sm:$0xff]  ;;  %1346 = vmatprep.mubr.msk.bf16.mxu0 %vm88_vm0, %v1507_v9  ;;  %v69_v13 = vld [vmem:[%s1829_s2 + $0x10] sm:$0xff]  ;;  %v68_v14 = vld [vmem:[%s1829_s2 + $0x8] sm:$0xff]  ;;  %s1610_s11 = smov 96  }
  0x29   :  { %v76_v10 = vpack.c.bf16 %v73_v5, %v72_v4  ;;  %146 = vperm.xlu0 %1505, %v67_v11   ;;  %v70_v15 = vld [vmem:[%s1829_s2 + $0x18] sm:$0xff]  ;;  %156 = vperm.xlu1 %1506, %v69_v13   ;;  %v1509_v16 = vld [vmem:[#allocation3 + $0x40] sm:$0xff]   ;;  %v1508_v17 = vld [vmem:[%s1828_s1 + $0x8] sm:$0xff]   ;;  %vm875_vm2 = vcmask 1041408   ;;  %vm757_vm5 = vcmask 158720   ;;  %vm1612_vm7 = vmmov 0  }
  0x2a   :  { %v77_v12 = vpack.c.bf16 %v75_v8, %v74_v7  ;;  %v1510_v18 = vld [vmem:[#allocation3 + $0x30] sm:$0xff]   ;;  %v1511_v19 = vld [vmem:[#allocation3 + $0x48] sm:$0xff]   ;;  %v1512_v20 = vld [vmem:[#allocation3 + $0x38] sm:$0xff]   ;;  %vm762_vm8 = vcmask 1043456  }
  0x2b   :  { %1342 = vmatprep.subr.bf16.mxu0 %v76_v10  ;;  %1358 = vmatprep.subr.bf16.mxu1 %v1510_v18  ;;  %v1513_v39 = vld [vmem:[#allocation3 + $0x50] sm:$0xff]   ;;  %v1514_v40 = vld [vmem:[#allocation3 + $0x58] sm:$0xff]   ;;  %v1252_v43 = vld [vmem:[%s1832_s5 + $0x4] ss:$0 sm:$0xff] }
  0x2c   :  { %1343 = vmatpush3.bf16.msra.mxu0 %v76_v10  ;;  %1359 = vmatpush3.bf16.msra.mxu1 %v1510_v18 }
  0x2d   :  { %1344 = vmatprep.subr.bf16.mxu0 %v77_v12  ;;  %151 = vperm.xlu0 %1505, %v68_v14  }
  0x2e   :  { %161 = vperm.xlu1 %1506, %v70_v15   ;;  %1360 = vmatprep.subr.bf16.mxu1 %v1512_v20 }
  0x30   :  { %1345 = vmatpush3.bf16.msra.mxu0 %v77_v12  ;;  %1361 = vmatpush3.bf16.msra.mxu1 %v1512_v20 }
  0x31   :  { %1350 = vmatprep.subr.bf16.mxu0 %v1509_v16  ;;  %1382 = vmatprep.subr.bf16.mxu1 %v1507_v9 }
  0x33   :  { %1347 = vmatmul.mubr.msk.bf16.vlgmr.msra.gmra.mrb[0].mxu0 %vm88_vm0, %v1508_v17 }
  0x34   :  { %1351 = vmatpush3.bf16.msra.mxu0 %v1509_v16  ;;  %1354 = vmatprep.mubr.msk.bf16.mxu0 %vm88_vm0, %v76_v10 }
  0x35   :  { %1352 = vmatprep.subr.bf16.mxu0 %v1511_v19 }
  0x38   :  { %1353 = vmatpush3.bf16.msra.mxu0 %v1511_v19 }
  0x39   :  { %1366 = vmatprep.subr.bf16.mxu0 %v1513_v39 }
  0x3b   :  { %1355 = vmatmul.mubr.msk.bf16.vlgmr.msra.gmra.mrb[4].mxu0 %vm88_vm0, %v77_v12 }
  0x3c   :  { %1367 = vmatpush3.bf16.msra.mxu0 %v1513_v39 }
  0x3d   :  { %1368 = vmatprep.subr.bf16.mxu0 %v1514_v40 }
  0x40   :  { %1369 = vmatpush3.bf16.msra.mxu0 %v1514_v40  ;;  %v1255_v40 = vld [vmem:[%s1832_s5 + $0x7] ss:$0 sm:$0xff] }
  0xa8   :  { %v157_v21 = vpop.permute.xlu1 %156  ;;  %v147_v22 = vpop.permute.xlu0 %146 }
  0xac   :  { %v152_v27 = vpop.permute.xlu0 %151 }
  0xad   :  { %v162_v25 = vpop.permute.xlu1 %161 }
 0x106   :  { %v1348_v23 = vpop.f32.mrb[0].mxu0 }
 0x107   :  { %v129_v24 = vpop.f32.mrb[1].mxu0  ;;  %v166_v28 = vmul.f32 %v1348_v23, %v157_v21 }
 0x108   :  { %v1349_v26 = vpop.f32.mrb[2].mxu0  ;;  %v164_v31 = vmul.f32 %v147_v22, %v129_v24  ;;  %v1253_v24 = vld [vmem:[%s1832_s5 + $0x5] ss:$0 sm:$0xff] }
 0x109   :  { %v167_v29 = vmul.f32 %v1349_v26, %v162_v25  ;;  %v132_v30 = vpop.f32.mrb[3].mxu0 }
 0x10a   :  { %v165_v32 = vmul.f32 %v152_v27, %v132_v30 }
 0x10b   :  { %v169_v33 = vpack.c.bf16 %v167_v29, %v166_v28  ;;  %v1254_v29 = vld [vmem:[%s1832_s5 + $0x6] ss:$0 sm:$0xff] }
 0x10c   :  { %v168_v34 = vpack.c.bf16 %v165_v32, %v164_v31 }
 0x10e   :  { %1362 = vmatprep.mubr.msk.bf16.mxu1 %vm88_vm0, %v168_v34  ;;  %v1356_v35 = vpop.f32.mrb[4].mxu0 }
 0x10f   :  { %1363 = vmatmul.mubr.msk.bf16.vlgmr.msra.gmra.mrb[0].mxu1 %vm88_vm0, %v169_v33  ;;  %v230_v36 = vpop.f32.mrb[5].mxu0 }
 0x110   :  { %1383 = vmatpush3.bf16.msra.mxu1 %v1507_v9  ;;  %v1357_v37 = vpop.f32.mrb[6].mxu0 }
 0x111   :  { %1384 = vmatprep.subr.bf16.mxu1 %v1508_v17  ;;  %v233_v38 = vpop.f32.mrb[7].mxu0 }
 0x114   :  { %1385 = vmatpush3.bf16.msra.mxu1 %v1508_v17 }
 0x1e2   :  { %v1364_v41 = vpop.f32.mrb[0].mxu1 }
 0x1e3   :  { %v306_v42 = vadd.f32 %v1364_v41, %v1356_v35  ;;  %v297_v44 = vpop.f32.mrb[1].mxu1 }
 0x1e4   :  { %v298_v45 = vadd.f32 %v297_v44, %v230_v36  ;;  %v1365_v46 = vpop.f32.mrb[2].mxu1 }
 0x1e5   :  { %v309_v47 = vadd.f32 %v1365_v46, %v1357_v37  ;;  %v300_v48 = vpop.f32.mrb[3].mxu1  ;;  %v319_v51 = vadd.f32 %v1252_v43, %v306_v42 }
 0x1e6   :  { %v317_v49 = vadd.f32 %v1252_v43, %v298_v45  ;;  %v301_v50 = vadd.f32 %v300_v48, %v233_v38 }
 0x1e7   :  { %v320_v54 = vadd.f32 %v1252_v43, %v309_v47  ;;  %v323_v56 = vmax.f32 %v319_v51, 0.0 }
 0x1e8   :  { %v318_v52 = vadd.f32 %v1252_v43, %v301_v50  ;;  %v321_v53 = vmax.f32 %v317_v49, 0.0 }
 0x1e9   :  { %v324_v58 = vmax.f32 %v320_v54, 0.0 }
 0x1ea   :  { %v322_v55 = vmax.f32 %v318_v52, 0.0 }
 0x1ec   :  { %v327_v57 = vadd.f32 %v322_v55, %v321_v53 }
 0x1ee   :  { %v328_v59 = vadd.f32 %v327_v57, %v323_v56 }
 0x1f0   :  { %v329_v60 = vadd.f32 %v328_v59, %v324_v58 }
 0x1f2   :  { %v330_v61 = vrot.slane %v329_v60, 4 }
 0x1f4   :  { %v331_v62 = vadd.f32 %v330_v61, %v329_v60 }
 0x1f6   :  { %v332_v63 = vrot.slane %v331_v62, 2 }
 0x1f8   :  { %v333_v0 = vadd.f32 %v332_v63, %v331_v62 }
 0x1fa   :  { %v334_v1 = vrot.slane %v333_v0, 1 }
 0x1fc   :  { %v335_v2 = vadd.f32 %v334_v1, %v333_v0 }
 0x1fe   :  { %v337_v3 = vmul.f32 0.03125, %v335_v2 }
 0x200   :  { %v338_v4 = vsub.f32 %v321_v53, %v337_v3  ;;  %v339_v5 = vsub.f32 %v322_v55, %v337_v3  ;;  %v340_v6 = vsub.f32 %v323_v56, %v337_v3  ;;  %v341_v7 = vsub.f32 %v324_v58, %v337_v3 }
 0x202   :  { %v342_v8 = vmul.f32 %v338_v4, %v338_v4  ;;  %v343_v9 = vmul.f32 %v339_v5, %v339_v5  ;;  %v344_v10 = vmul.f32 %v340_v6, %v340_v6  ;;  %v345_v12 = vmul.f32 %v341_v7, %v341_v7 }
 0x204   :  { %v346_v11 = vadd.f32 %v343_v9, %v342_v8 }
 0x206   :  { %v347_v13 = vadd.f32 %v346_v11, %v344_v10 }
 0x208   :  { %v348_v14 = vadd.f32 %v347_v13, %v345_v12 }
 0x20a   :  { %v349_v15 = vrot.slane %v348_v14, 4 }
 0x20c   :  { %v350_v16 = vadd.f32 %v349_v15, %v348_v14 }
 0x20e   :  { %v351_v17 = vrot.slane %v350_v16, 2 }
 0x210   :  { %v352_v18 = vadd.f32 %v351_v17, %v350_v16 }
 0x212   :  { %v353_v19 = vrot.slane %v352_v18, 1 }
 0x214   :  { %v354_v20 = vadd.f32 %v353_v19, %v352_v18 }
 0x216   :  { %v355_v21 = vmul.f32 0.03125, %v354_v20 }
 0x218   :  { %v356_v22 = vadd.f32 1e-05, %v355_v21 }
 0x21a   :  { %1519 = vrsqrt.f32 %v356_v22 }
 0x224   :  { %v1520_v23 = vpop.eup %1519 }
 0x225   :  { %v359_v25 = vmul.f32 %v1520_v23, %v339_v5  ;;  %v360_v26 = vmul.f32 %v1520_v23, %v340_v6  ;;  %v358_v27 = vmul.f32 %v1520_v23, %v338_v4  ;;  %v361_v28 = vmul.f32 %v1520_v23, %v341_v7 }
 0x227   :  { %v367_v30 = vmul.f32 %v1253_v24, %v359_v25  ;;  %v366_v31 = vmul.f32 %v1253_v24, %v358_v27  ;;  %v368_v32 = vmul.f32 %v1253_v24, %v360_v26  ;;  %v369_v33 = vmul.f32 %v1253_v24, %v361_v28 }
 0x229   :  { %v374_v34 = vadd.f32 %v1254_v29, %v366_v31  ;;  %v375_v35 = vadd.f32 %v1254_v29, %v367_v30  ;;  %v376_v36 = vadd.f32 %v1254_v29, %v368_v32  ;;  %v377_v37 = vadd.f32 %v1254_v29, %v369_v33  ;;  %v1515_v31 = vld [vmem:[#allocation3 + $0x70] sm:$0xff]   ;;  %v1516_v32 = vld [vmem:[#allocation3 + $0x78] sm:$0xff]  }
 0x22b   :  { %v382_v38 = vpack.c.bf16 %v375_v35, %v374_v34  ;;  %v383_v39 = vpack.c.bf16 %v377_v37, %v376_v36 }
 0x22d   :  { %1370 = vmatprep.mubr.msk.bf16.mxu0 %vm88_vm0, %v382_v38 }
 0x22e   :  { %1371 = vmatmul.mubr.msk.bf16.vlgmr.msra.gmra.mrb[8].mxu0 %vm88_vm0, %v383_v39 }
 0x301   :  { %v1372_v41 = vpop.f32.mrb[8].mxu0 }
 0x302   :  { %v441_v42 = vpop.f32.mrb[9].mxu0  ;;  %v450_v43 = vadd.f32 %v1372_v41, %v1255_v40 }
 0x303   :  { %v442_v44 = vadd.f32 %v1255_v40, %v441_v42  ;;  %v1373_v45 = vpop.f32.mrb[10].mxu0 }
 0x304   :  { %v444_v46 = vpop.f32.mrb[11].mxu0  ;;  %v458_v49 = vmax.f32 %v450_v43, 0.0  ;;  %v453_v50 = vadd.f32 %v1373_v45, %v1255_v40 }
 0x305   :  { %v456_v47 = vmax.f32 %v442_v44, 0.0  ;;  %v445_v48 = vadd.f32 %v1255_v40, %v444_v46 }
 0x306   :  { %v459_v54 = vmax.f32 %v453_v50, 0.0  ;;  %v467_v55 = vsel %vm460_vm1, %v458_v49, -inf }
 0x307   :  { %v457_v51 = vmax.f32 %v445_v48, 0.0  ;;  %v461_v52 = vsel %vm460_vm1, %v456_v47, -inf }
 0x308   :  { %462 = vmax.xlane.f32.xlu0 %v461_v52  ;;  %v470_v56 = vsel %vm460_vm1, %v459_v54, -inf }
 0x309   :  { %v464_v53 = vsel %vm460_vm1, %v457_v51, -inf }
 0x30a   :  { %465 = vmax.xlane.f32.xlu1 %v464_v53  ;;  %v739_v53 = vlaneseq }
 0x30c   :  { %468 = vmax.xlane.f32.xlu0 %v467_v55 }
 0x310   :  { %471 = vmax.xlane.f32.xlu0 %v470_v56  ;;  %v740_v56 = vshrl.u32 %v739_v53, 7 }
 0x395   :  { %v463_v57 = vpop.xlane.xlu0 %462 }
 0x396   :  { %v473_v58 = vsub.f32 %v456_v47, %v463_v57  ;;  %v1765_v57 = vand.u32 127, %v739_v53 }
 0x397   :  { %v466_v59 = vpop.xlane.xlu1 %465 }
 0x398   :  { %v477_v60 = vmul.f32 1.442695, %v473_v58  ;;  %v474_v61 = vsub.f32 %v457_v51, %v466_v59  ;;  %vm745_vm3 = vcmp.eq.s32.totalorder %v740_v56, %v1765_v57  ;;  %vm1227_vm11 = vcmp.eq.s32.totalorder %v1765_v57, 9 }
 0x399   :  { %v469_v62 = vpop.xlane.xlu0 %468  ;;  %vm1230_vm12 = vcmp.eq.s32.totalorder %v1765_v57, 10 }
 0x39a   :  { %1521 = vpow2.f32 %v477_v60  ;;  %v479_v63 = vmul.f32 1.442695, %v474_v61  ;;  %v475_v0 = vsub.f32 %v458_v49, %v469_v62  ;;  %v741_v60 = vadd.s32 8, %v740_v56 }
 0x39c   :  { %1523 = vpow2.f32 %v479_v63  ;;  %v481_v1 = vmul.f32 1.442695, %v475_v0  ;;  %vm746_vm4 = vcmp.eq.s32.totalorder %v741_v60, %v1765_v57 }
 0x39d   :  { %v472_v2 = vpop.xlane.xlu0 %471 }
 0x39e   :  { %1525 = vpow2.f32 %v481_v1  ;;  %v476_v3 = vsub.f32 %v459_v54, %v472_v2  ;;  %v742_v2 = vadd.s32 16, %v740_v56 }
 0x3a0   :  { %v483_v4 = vmul.f32 1.442695, %v476_v3  ;;  %vm747_vm6 = vcmp.eq.s32.totalorder %v742_v2, %v1765_v57  ;;  %v1141_v2 = vld [vmem:[#allocation5 + $0x8] sm:$0xff] }
 0x3a2   :  { %1527 = vpow2.f32 %v483_v4 }
 0x3a4   :  { %v1522_v5 = vpop.eup %1521 }
 0x3a5   :  { %v485_v6 = vsel %vm460_vm1, %v1522_v5, 0.0 }
 0x3a6   :  { %v1524_v7 = vpop.eup %1523  ;;  %486 = vadd.xlane.f32.xlu1 %v485_v6 }
 0x3a7   :  { %v488_v8 = vsel %vm460_vm1, %v1524_v7, 0.0 }
 0x3a8   :  { %v1526_v9 = vpop.eup %1525  ;;  %489 = vadd.xlane.f32.xlu0 %v488_v8 }
 0x3a9   :  { %v491_v10 = vsel %vm460_vm1, %v1526_v9, 0.0 }
 0x3aa   :  { %492 = vadd.xlane.f32.xlu1 %v491_v10 }
 0x3ac   :  { %v1528_v11 = vpop.eup %1527 }
 0x3ad   :  { %v494_v12 = vsel %vm460_vm1, %v1528_v11, 0.0 }
 0x3ae   :  { %495 = vadd.xlane.f32.xlu0 %v494_v12 }
 0x3c4   :  { %525 = vrot.lane.b32.xlu0 %v382_v38, %s1610_s11 }
 0x3c8   :  { %527 = vrot.lane.b32.xlu0 %v383_v39, %s1610_s11 }
 0x433   :  { %v487_v13 = vpop.xlane.xlu1 %486 }
 0x434   :  { %1529 = vrcp.f32 %v487_v13 }
 0x435   :  { %v490_v14 = vpop.xlane.xlu0 %489 }
 0x436   :  { %1531 = vrcp.f32 %v490_v14 }
 0x437   :  { %v493_v15 = vpop.xlane.xlu1 %492 }
 0x438   :  { %1533 = vrcp.f32 %v493_v15 }
 0x43b   :  { %v496_v16 = vpop.xlane.xlu0 %495 }
 0x43c   :  { %1535 = vrcp.f32 %v496_v16 }
 0x43e   :  { %v1530_v17 = vpop.eup %1529 }
 0x43f   :  { %v526_v18 = vpop.permute.xlu0 %525  ;;  %v1741_v20 = vmul.f32 %v1530_v17, %v1522_v5 }
 0x440   :  { %v1532_v19 = vpop.eup %1531  ;;  %1374 = vmatprep.subr.bf16.mxu0 %v526_v18 }
 0x441   :  { %v1743_v21 = vmul.f32 %v1532_v19, %v1524_v7  ;;  %1375 = vmatpush3.bf16.msra.mxu0 %v526_v18  ;;  %v809_v54 = vadd.f32 1e-15, %v1741_v20 }
 0x442   :  { %v1534_v24 = vpop.eup %1533 }
 0x443   :  { %v528_v22 = vpop.permute.xlu0 %527  ;;  %v505_v23 = vpack.c.bf16 %v1743_v21, %v1741_v20  ;;  %v1747_v26 = vmul.f32 %v1534_v24, %v1526_v9  ;;  %v810_v55 = vadd.f32 1e-15, %v1743_v21  ;;  %1537 = vlog2.f32 %v809_v54 }
 0x444   :  { %1376 = vmatprep.subr.bf16.mxu0 %v528_v22 }
 0x445   :  { %507 = vxpose.xlu1.c.b16.start [1/2] (short) (narrow) %v505_v23, 32  ;;  %1377 = vmatpush3.bf16.msra.mxu0 %v528_v22  ;;  %v811_v58 = vadd.f32 1e-15, %v1747_v26  ;;  %1539 = vlog2.f32 %v810_v55 }
 0x446   :  { %v1536_v25 = vpop.eup %1535  ;;  %1398 = vmatprep.subr.bf16.mxu1 %v505_v23  ;;  %1390 = vmatprep.subr.bf16.mxu0 %v505_v23 }
 0x447   :  { %v1749_v27 = vmul.f32 %v1536_v25, %v1528_v11  ;;  %1541 = vlog2.f32 %v811_v58 }
 0x449   :  { %v506_v28 = vpack.c.bf16 %v1749_v27, %v1747_v26  ;;  %v812_v62 = vadd.f32 1e-15, %v1749_v27 }
 0x44b   :  { %508 = vxpose.xlu1.c.b16.end [2/2] (short) (narrow) %v506_v28, 32  ;;  %1543 = vlog2.f32 %v812_v62 }
 0x44d   :  { %v1538_v14 = vpop.eup %1537 }
 0x44f   :  { %v1540_v18 = vpop.eup %1539 }
 0x451   :  { %v1542_v24 = vpop.eup %1541 }
 0x4ad   :  { %v515_v29 = vpop.trf.xlu1 }
 0x4ae   :  { %1378 = vmatprep.mubr.msk.bf16.mxu0 %vm88_vm0, %v515_v29  ;;  %1386 = vmatprep.mubr.msk.bf16.mxu1 %vm88_vm0, %v515_v29 }
 0x4b1   :  { %v516_v30 = vpop.trf.xlu1 }
 0x4b2   :  { %1379 = vmatmul.mubr.msk.bf16.vlgmr.msra.gmra.mrb[12].mxu0 %vm88_vm0, %v516_v30  ;;  %1387 = vmatmul.mubr.msk.bf16.vlgmr.msra.gmra.mrb[4].mxu1 %vm88_vm0, %v516_v30 }
 0x4b3   :  { %1391 = vmatpush3.bf16.msra.mxu0 %v505_v23  ;;  %1399 = vmatpush3.bf16.msra.mxu1 %v505_v23  ;;  %v814_v23 = vmul.f32 0.6931472, %v1538_v14  ;;  %v1147_v14 = vld [vmem:[#allocation5 + $0x38] sm:$0xff] }
 0x4b4   :  { %1392 = vmatprep.subr.bf16.mxu0 %v506_v28  ;;  %1400 = vmatprep.subr.bf16.mxu1 %v506_v28 }
 0x4b5   :  { %1402 = vmatprep.mubr.msk.bf16.mxu1 %vm88_vm0, %v515_v29  ;;  %v805_v29 = vsub.f32 0.0, %v1741_v20 }
 0x4b7   :  { %1393 = vmatpush3.bf16.msra.mxu0 %v506_v28  ;;  %1401 = vmatpush3.bf16.msra.mxu1 %v506_v28 }
 0x4b8   :  { %1414 = vmatprep.subr.bf16.mxu1 %v1515_v31 }
 0x4ba   :  { %1403 = vmatmul.mubr.msk.bf16.vlgmr.msra.gmra.mrb[8].mxu1 %vm88_vm0, %v516_v30  ;;  %v816_v30 = vmul.f32 0.6931472, %v1540_v18 }
 0x4bb   :  { %1415 = vmatpush3.bf16.msra.mxu1 %v1515_v31  ;;  %v1544_v31 = vpop.eup %1543 }
 0x4bc   :  { %1416 = vmatprep.subr.bf16.mxu1 %v1516_v32 }
 0x4bf   :  { %1417 = vmatpush3.bf16.msra.mxu1 %v1516_v32 }
 0x585   :  { %v1380_v33 = vpop.f32.mrb[12].mxu0  ;;  %v1388_v34 = vpop.f32.mrb[4].mxu1 }
 0x586   :  { %v571_v35 = vpop.f32.mrb[13].mxu0  ;;  %v621_v36 = vpop.f32.mrb[5].mxu1  ;;  %v866_v39 = vmax.f32 %v1380_v33, 0.0  ;;  %v636_v45 = vpack.c.bf16 %v1388_v34, %v1388_v34  ;;  %v821_v33 = vmul.f32 %v814_v23, %v805_v29  ;;  %v806_v34 = vsub.f32 0.0, %v1743_v21  ;;  %v1151_v23 = vld [vmem:[#allocation5 + $0x58] sm:$0xff] }
 0x587   :  { %v1381_v37 = vpop.f32.mrb[14].mxu0  ;;  %v1389_v38 = vpop.f32.mrb[6].mxu1  ;;  %v864_v42 = vmax.f32 %v571_v35, 0.0  ;;  %v818_v35 = vmul.f32 0.6931472, %v1542_v24 }
 0x588   :  { %v574_v40 = vpop.f32.mrb[15].mxu0  ;;  %v624_v41 = vpop.f32.mrb[7].mxu1  ;;  %v868_v47 = vpack.c.bf16 %v866_v39, %v866_v39  ;;  %v822_v37 = vmul.f32 %v816_v30, %v806_v34  ;;  %v807_v38 = vsub.f32 0.0, %v1747_v26  ;;  %v820_v39 = vmul.f32 0.6931472, %v1544_v31  ;;  %v1518_v26 = vld [vmem:[#allocation3 + $0x68] sm:$0xff]  }
 0x589   :  { %v865_v43 = vmax.f32 %v574_v40, 0.0  ;;  %v635_v44 = vpack.c.bf16 %v624_v41, %v621_v36  ;;  %v825_v40 = vsel %vm460_vm1, %v821_v33, 0.0  ;;  %v808_v41 = vsub.f32 0.0, %v1749_v27  ;;  %v1154_v30 = vld [vmem:[#allocation5 + $0x70] sm:$0xff]  ;;  %v1155_v31 = vld [vmem:[#allocation5 + $0x78] sm:$0xff] }
 0x58a   :  { %v877_v52 = vsel %vm875_vm2, %v868_v47, 0  ;;  %v823_v20 = vmul.f32 %v818_v35, %v807_v38  ;;  %v1278_v34 = vld [vmem:[%s1832_s5 + $0x8] ss:$0 sm:$0xff] }
 0x58b   :  { %v867_v46 = vpack.c.bf16 %v865_v43, %v864_v42  ;;  %1394 = vmatprep.mubr.msk.bf16.mxu0 %vm88_vm0, %v635_v44  ;;  %v828_v42 = vsel %vm460_vm1, %v822_v37, 0.0  ;;  %v824_v43 = vmul.f32 %v820_v39, %v808_v41 }
 0x58c   :  { %1395 = vmatmul.mubr.msk.bf16.vlgmr.msra.gmra.mrb[16].mxu0 %vm88_vm0, %v636_v45  ;;  %v831_v21 = vsel %vm460_vm1, %v823_v20, 0.0  ;;  %v1517_v45 = vld [vmem:[#allocation3 + $0x60] sm:$0xff]  }
 0x58d   :  { %v1404_v48 = vpop.f32.mrb[8].mxu1  ;;  %1406 = vmatprep.subr.bf16.mxu0 %v867_v46  ;;  %1418 = vmatprep.mubr.msk.bf16.mxu1 %vm88_vm0, %v867_v46  ;;  %v834_v44 = vsel %vm460_vm1, %v824_v43, 0.0 }
 0x58e   :  { %v725_v49 = vpop.f32.mrb[9].mxu1  ;;  %1407 = vmatpush3.bf16.msra.mxu0 %v867_v46  ;;  %1419 = vmatmul.mubr.msk.bf16.vlgmr.msra.gmra.mrb[12].mxu1 %vm88_vm0, %v868_v47  ;;  %v773_v25 = vmul.f32 %v1404_v48, %v1404_v48 }
 0x58f   :  { %v1405_v50 = vpop.f32.mrb[10].mxu1  ;;  %1493 = vmatprep.subr.msk.bf16.mxu0 %vm875_vm2, %v868_v47  ;;  %v771_v16 = vmul.f32 %v725_v49, %v725_v49 }
 0x590   :  { %v728_v51 = vpop.f32.mrb[11].mxu1  ;;  %v780_v36 = vsel %vm757_vm5, %v773_v25, 0.0  ;;  %v1152_v25 = vld [vmem:[#allocation5 + $0x60] sm:$0xff] }
 0x591   :  { %v772_v19 = vmul.f32 %v728_v51, %v728_v51  ;;  %v774_v28 = vsel %vm460_vm1, %v771_v16, 0.0  ;;  %v1148_v16 = vld [vmem:[#allocation5 + $0x40] sm:$0xff] }
 0x592   :  { %1409 = vmatpush3.bf16.msra.mxu0 %v877_v52 }
 0x593   :  { %v777_v32 = vsel %vm460_vm1, %v772_v19, 0.0  ;;  %1422 = vmatprep.subr.bf16.mxu0 %v1517_v45  ;;  %v1613_v19 = vmov 0.0  }
 0x594   :  { %1462 = vmatprep.mubr.msk.f32.mxu1 %vm1612_vm7, %v1613_v19 }
 0x65f   :  { %v1396_v59 = vpop.f32.mrb[16].mxu0 }
 0x660   :  { %v677_v61 = vpop.f32.mrb[17].mxu0  ;;  %v863_v8 = vpack.c.bf16 %v1396_v59, %v1396_v59  ;;  %v853_v11 = vsel %vm757_vm5, %v1396_v59, 0.0  ;;  %v750_v15 = vsel %vm747_vm6, %v1396_v59, 0.0 }
 0x661   :  { %v1397_v63 = vpop.f32.mrb[18].mxu0  ;;  %v1769_v0 = vpop.f32.mrb[12].mxu1  ;;  %v847_v1 = vsel %vm460_vm1, %v677_v61, 0.0  ;;  %v748_v10 = vsel %vm745_vm3, %v677_v61, 0.0  ;;  %v758_v22 = vsel %vm757_vm5, %v750_v15, 0.0 }
 0x662   :  { %v1773_v3 = vpop.f32.mrb[13].mxu1  ;;  %848 = vadd.xlane.f32.xlu0 %v847_v1  ;;  %v680_v4 = vpop.f32.mrb[19].mxu0  ;;  %v751_v13 = vsel %vm460_vm1, %v748_v10, 0.0  ;;  %v1140_v1 = vld [vmem:[#allocation5] sm:$0xff] }
 0x663   :  { %v862_v5 = vpack.c.bf16 %v680_v4, %v677_v61  ;;  %v1421_v6 = vpop.f32.mrb[14].mxu1  ;;  %v850_v7 = vsel %vm460_vm1, %v680_v4, 0.0  ;;  %v749_v12 = vsel %vm746_vm4, %v680_v4, 0.0  ;;  %v1466_v4 = vpack.c.bf16 %v1141_v2, %v1140_v1  ;;  %v1144_v10 = vld [vmem:[#allocation5 + $0x20] sm:$0xff] }
 0x664   :  { %v1777_v9 = vpop.f32.mrb[15].mxu1  ;;  %851 = vadd.xlane.f32.xlu1 %v850_v7  ;;  %v754_v17 = vsel %vm460_vm1, %v749_v12, 0.0  ;;  %v1142_v6 = vld [vmem:[#allocation5 + $0x10] sm:$0xff]  ;;  %v1143_v7 = vld [vmem:[#allocation5 + $0x18] sm:$0xff] }
 0x665   :  { %1410 = vmatprep.mubr.msk.bf16.mxu0 %vm460_vm1, %v862_v5  ;;  %v1611_v5 = vmov 0.0|0.0  }
 0x666   :  { %854 = vadd.xlane.f32.xlu0 %v853_v11  ;;  %1411 = vmatmul.mubr.msk.bf16.vlgmr.msra.gmra.mrb[20].mxu0 %vm460_vm1, %v863_v8  ;;  %v1469_v8 = vpack.c.bf16 %v1143_v7, %v1142_v6  ;;  %v1145_v11 = vld [vmem:[#allocation5 + $0x28] sm:$0xff] }
 0x667   :  { %1423 = vmatpush3.bf16.msra.mxu0 %v1517_v45  ;;  %1465 = vmatprep.subr.bf16.mxu1 %v1611_v5  ;;  %v1472_v12 = vpack.c.bf16 %v1145_v11, %v1144_v10  ;;  %v1279_v7 = vld [vmem:[%s1832_s5 + $0x9] ss:$0 sm:$0xff] }
 0x668   :  { %752 = vadd.xlane.f32.xlu1 %v751_v13  ;;  %1424 = vmatprep.subr.bf16.mxu0 %v1518_v26  ;;  %v1146_v13 = vld [vmem:[#allocation5 + $0x30] sm:$0xff] }
 0x669   :  { %1467 = vmatpush3.bf16.msra.mxu1 %v1466_v4  ;;  %v1475_v15 = vpack.c.bf16 %v1147_v14, %v1146_v13 }
 0x66a   :  { %755 = vadd.xlane.f32.xlu0 %v754_v17  ;;  %1468 = vmatprep.subr.bf16.mxu1 %v1611_v5  ;;  %v1149_v17 = vld [vmem:[#allocation5 + $0x48] sm:$0xff] }
 0x66b   :  { %1425 = vmatpush3.bf16.msra.mxu0 %v1518_v26  ;;  %v1478_v18 = vpack.c.bf16 %v1149_v17, %v1148_v16 }
 0x66c   :  { %759 = vadd.xlane.f32.xlu1 %v758_v22  ;;  %v1150_v22 = vld [vmem:[#allocation5 + $0x50] sm:$0xff] }
 0x66d   :  { %1470 = vmatpush3.bf16.msra.mxu1 %v1469_v8  ;;  %v1481_v24 = vpack.c.bf16 %v1151_v23, %v1150_v22 }
 0x66e   :  { %775 = vadd.xlane.f32.xlu0 %v774_v28  ;;  %1471 = vmatprep.subr.bf16.mxu1 %v1611_v5  ;;  %v1153_v28 = vld [vmem:[#allocation5 + $0x68] sm:$0xff] }
 0x66f   :  { %v1484_v29 = vpack.c.bf16 %v1153_v28, %v1152_v25 }
 0x670   :  { %778 = vadd.xlane.f32.xlu1 %v777_v32  ;;  %v1487_v32 = vpack.c.bf16 %v1155_v31, %v1154_v30 }
 0x671   :  { %1473 = vmatpush3.bf16.msra.mxu1 %v1472_v12  ;;  %v1280_v12 = vld [vmem:[%s1832_s5 + $0xa] ss:$0 sm:$0xff] }
 0x672   :  { %781 = vadd.xlane.f32.xlu0 %v780_v36  ;;  %1474 = vmatprep.subr.bf16.mxu1 %v1611_v5 }
 0x674   :  { %826 = vadd.xlane.f32.xlu1 %v825_v40 }
 0x675   :  { %1476 = vmatpush3.bf16.msra.mxu1 %v1475_v15 }
 0x676   :  { %829 = vadd.xlane.f32.xlu0 %v828_v42  ;;  %1477 = vmatprep.subr.bf16.mxu1 %v1611_v5 }
 0x678   :  { %832 = vadd.xlane.f32.xlu1 %v831_v21 }
 0x679   :  { %1479 = vmatpush3.bf16.msra.mxu1 %v1478_v18 }
 0x67a   :  { %835 = vadd.xlane.f32.xlu0 %v834_v44  ;;  %1480 = vmatprep.subr.bf16.mxu1 %v1611_v5 }
 0x67d   :  { %1482 = vmatpush3.bf16.msra.mxu1 %v1481_v24 }
 0x67e   :  { %1483 = vmatprep.subr.bf16.mxu1 %v1611_v5 }
 0x681   :  { %1485 = vmatpush3.bf16.msra.mxu1 %v1484_v29 }
 0x682   :  { %1486 = vmatprep.subr.bf16.mxu1 %v1611_v5 }
 0x685   :  { %1488 = vmatpush3.bf16.msra.mxu1 %v1487_v32 }
 0x6ef   :  { %v849_v46 = vpop.xlane.xlu0 %848 }
 0x6f0   :  { %v856_v48 = vmax.f32 %v849_v46, 1.0 }
 0x6f1   :  { %v852_v27 = vpop.xlane.xlu1 %851 }
 0x6f2   :  { %v857_v50 = vmax.f32 %v852_v27, 1.0  ;;  %1545 = vrcp.f32 %v856_v48 }
 0x6f3   :  { %v855_v47 = vpop.xlane.xlu0 %854 }
 0x6f4   :  { %v858_v49 = vmax.f32 %v855_v47, 1.0 }
 0x6f6   :  { %1547 = vrcp.f32 %v858_v49 }
 0x6f7   :  { %1549 = vrcp.f32 %v857_v50 }
 0x6fc   :  { %v1546_v52 = vpop.eup %1545 }
 0x700   :  { %v1548_v54 = vpop.eup %1547 }
 0x701   :  { %v1550_v56 = vpop.eup %1549 }
 0x739   :  { %v1412_v51 = vpop.f32.mrb[20].mxu0 }
 0x73a   :  { %v913_v53 = vpop.f32.mrb[21].mxu0  ;;  %v929_v58 = vmul.f32 %v1548_v54, %v1412_v51 }
 0x73b   :  { %v1413_v55 = vpop.f32.mrb[22].mxu0  ;;  %v927_v60 = vmul.f32 %v1546_v52, %v913_v53 }
 0x73c   :  { %v916_v59 = vpop.f32.mrb[23].mxu0  ;;  %v931_v63 = vpack.c.bf16 %v929_v58, %v929_v58 }
 0x73d   :  { %v928_v61 = vmul.f32 %v1550_v56, %v916_v59 }
 0x73f   :  { %v930_v62 = vpack.c.bf16 %v928_v61, %v927_v60 }
 0x741   :  { %1426 = vmatprep.mubr.msk.bf16.mxu0 %vm88_vm0, %v930_v62 }
 0x742   :  { %1427 = vmatmul.mubr.msk.bf16.vlgmr.msra.gmra.mrb[24].mxu0 %vm88_vm0, %v931_v63 }
 0x815   :  { %v1428_v33 = vpop.f32.mrb[24].mxu0 }
 0x816   :  { %v1066_v35 = vadd.f32 %v1428_v33, %v1769_v0  ;;  %v1057_v36 = vpop.f32.mrb[25].mxu0  ;;  %v753_v33 = vpop.xlane.xlu1 %752 }
 0x817   :  { %v1058_v37 = vadd.f32 %v1057_v36, %v1773_v3  ;;  %v1429_v38 = vpop.f32.mrb[26].mxu0 }
 0x818   :  { %v1078_v39 = vadd.f32 %v1278_v34, %v1066_v35  ;;  %v1060_v40 = vpop.f32.mrb[27].mxu0 }
 0x819   :  { %v1076_v20 = vadd.f32 %v1278_v34, %v1058_v37  ;;  %v1061_v41 = vadd.f32 %v1060_v40, %v1777_v9 }
 0x81a   :  { %v1081_v43 = vmax.f32 %v1078_v39, 0.0  ;;  %v760_v35 = vpop.xlane.xlu1 %759 }
 0x81b   :  { %v1077_v42 = vadd.f32 %v1278_v34, %v1061_v41  ;;  %v1079_v21 = vmax.f32 %v1076_v20, 0.0  ;;  %v756_v34 = vpop.xlane.xlu0 %755  ;;  %v763_v38 = vsel %vm762_vm8, %v760_v35, 0.0 }
 0x81c   :  { %v1085_v26 = vsel %vm762_vm8, %v1081_v43, 0.0  ;;  %v761_v37 = vadd.f32 %v756_v34, %v753_v33 }
 0x81d   :  { %v1080_v44 = vmax.f32 %v1077_v42, 0.0 }
 0x81e   :  { %v779_v39 = vpop.xlane.xlu1 %778  ;;  %v764_v40 = vadd.f32 %v763_v38, %v761_v37 }
 0x81f   :  { %v1084_v45 = vadd.f32 %v1080_v44, %v1079_v21  ;;  %v776_v36 = vpop.xlane.xlu0 %775 }
 0x820   :  { %v783_v41 = vadd.f32 %v779_v39, %v776_v36 }
 0x821   :  { %v1086_v46 = vadd.f32 %v1085_v26, %v1084_v45 }
 0x823   :  { %v1087_v47 = vrot.slane %v1086_v46, 4  ;;  %v782_v20 = vpop.xlane.xlu0 %781 }
 0x824   :  { %v784_v42 = vsel %vm762_vm8, %v782_v20, 0.0 }
 0x825   :  { %v1088_v0 = vadd.f32 %v1087_v47, %v1086_v46 }
 0x827   :  { %v1089_v27 = vrot.slane %v1088_v0, 2 }
 0x829   :  { %v1090_v48 = vadd.f32 %v1089_v27, %v1088_v0 }
 0x82b   :  { %v1091_v3 = vrot.slane %v1090_v48, 1 }
 0x82d   :  { %v1092_v49 = vadd.f32 %v1091_v3, %v1090_v48 }
 0x82f   :  { %v1094_v50 = vmul.f32 0.05, %v1092_v49 }
 0x831   :  { %v1095_v51 = vsub.f32 %v1079_v21, %v1094_v50  ;;  %v1096_v52 = vsub.f32 %v1080_v44, %v1094_v50  ;;  %v1097_v53 = vsub.f32 %v1081_v43, %v1094_v50  ;;  %v765_v43 = vrot.slane %v764_v40, 4  ;;  %v827_v50 = vpop.xlane.xlu1 %826 }
 0x832   :  { %v785_v21 = vadd.f32 %v784_v42, %v783_v41 }
 0x833   :  { %v1098_v9 = vmul.f32 %v1095_v51, %v1095_v51  ;;  %v1099_v54 = vmul.f32 %v1096_v52, %v1096_v52  ;;  %v1100_v55 = vmul.f32 %v1097_v53, %v1097_v53  ;;  %v766_v44 = vadd.f32 %v765_v43, %v764_v40 }
 0x834   :  { %v786_v45 = vrot.slane %v785_v21, 4 }
 0x835   :  { %v1101_v56 = vadd.f32 %v1099_v54, %v1098_v9  ;;  %v1102_v58 = vsel %vm762_vm8, %v1100_v55, 0.0  ;;  %v767_v26 = vrot.slane %v766_v44, 2 }
 0x836   :  { %v787_v46 = vadd.f32 %v786_v45, %v785_v21 }
 0x837   :  { %v1103_v59 = vadd.f32 %v1102_v58, %v1101_v56  ;;  %v768_v47 = vadd.f32 %v767_v26, %v766_v44  ;;  %v833_v56 = vpop.xlane.xlu1 %832 }
 0x838   :  { %v788_v0 = vrot.slane %v787_v46, 2 }
 0x839   :  { %v1104_v60 = vrot.slane %v1103_v59, 4  ;;  %v769_v27 = vrot.slane %v768_v47, 1 }
 0x83a   :  { %v789_v48 = vadd.f32 %v788_v0, %v787_v46 }
 0x83b   :  { %v1105_v61 = vadd.f32 %v1104_v60, %v1103_v59  ;;  %v770_v3 = vadd.f32 %v769_v27, %v768_v47 }
 0x83c   :  { %v790_v49 = vrot.slane %v789_v48, 1 }
 0x83d   :  { %v1106_v62 = vrot.slane %v1105_v61, 2 }
 0x83e   :  { %v791_v9 = vadd.f32 %v790_v49, %v789_v48 }
 0x83f   :  { %v1107_v63 = vadd.f32 %v1106_v62, %v1105_v61 }
 0x841   :  { %v1108_v1 = vrot.slane %v1107_v63, 1 }
 0x843   :  { %v1109_v2 = vadd.f32 %v1108_v1, %v1107_v63 }
 0x845   :  { %v1110_v4 = vmul.f32 0.05, %v1109_v2 }
 0x847   :  { %v1111_v5 = vadd.f32 1e-05, %v1110_v4 }
 0x849   :  { %1551 = vrsqrt.f32 %v1111_v5 }
 0x853   :  { %v1552_v6 = vpop.eup %1551 }
 0x854   :  { %v1113_v8 = vmul.f32 %v1552_v6, %v1095_v51  ;;  %v1114_v10 = vmul.f32 %v1552_v6, %v1096_v52  ;;  %v1115_v11 = vmul.f32 %v1552_v6, %v1097_v53  ;;  %v792_v51 = vmul.f32 2.0, %v770_v3  ;;  %v830_v52 = vpop.xlane.xlu0 %829 }
 0x855   :  { %v793_v53 = vstv %s1830_s3  ;;  %v837_v54 = vadd.f32 %v830_v52, %v827_v50 }
 0x856   :  { %v1120_v13 = vmul.f32 %v1279_v7, %v1113_v8  ;;  %v1121_v14 = vmul.f32 %v1279_v7, %v1114_v10  ;;  %v1122_v15 = vmul.f32 %v1279_v7, %v1115_v11  ;;  %v794_v55 = vsub.f32 %v793_v53, %v792_v51 }
 0x857   :  { %v838_v59 = vadd.f32 %v837_v54, %v833_v56 }
 0x858   :  { %v1127_v16 = vadd.f32 %v1280_v12, %v1120_v13  ;;  %v1128_v17 = vadd.f32 %v1280_v12, %v1121_v14  ;;  %v1129_v18 = vadd.f32 %v1280_v12, %v1122_v15  ;;  %v795_v58 = vadd.f32 %v794_v55, %v791_v9  ;;  %v836_v60 = vpop.xlane.xlu0 %835  ;;  %v1156_v14 = vld [vmem:[%s1834_s7] sm:$0x1] }
 0x859   :  { %v839_v62 = vadd.f32 %v838_v59, %v836_v60 }
 0x85a   :  { %v1130_v19 = vadd.f32 %v1128_v17, %v1127_v16  ;;  %v1131_v22 = vsel %vm762_vm8, %v1129_v18, 0.0  ;;  %v796_v61 = vmax.f32 %v795_v58, 0.0 }
 0x85b   :  { %v840_v63 = vrot.slane %v839_v62, 4 }
 0x85c   :  { %v1132_v23 = vadd.f32 %v1131_v22, %v1130_v19  ;;  %1553 = vrsqrt.f32 %v796_v61  ;;  %vm799_vm9 = vcmp.eq.f32.partialorder %v796_v61, inf  ;;  %v802_v10 = vand.u32 2147483648, %v796_v61 }
 0x85d   :  { %v841_v1 = vadd.f32 %v840_v63, %v839_v62  ;;  %vm801_vm10 = vcmp.eq.f32.partialorder %v796_v61, 0.0 }
 0x85e   :  { %v1133_v24 = vrot.slane %v1132_v23, 4 }
 0x85f   :  { %v842_v2 = vrot.slane %v841_v1, 2 }
 0x860   :  { %v1134_v25 = vadd.f32 %v1133_v24, %v1132_v23 }
 0x861   :  { %v843_v5 = vadd.f32 %v842_v2, %v841_v1 }
 0x862   :  { %v1135_v28 = vrot.slane %v1134_v25, 2 }
 0x863   :  { %v844_v7 = vrot.slane %v843_v5, 1 }
 0x864   :  { %v1136_v29 = vadd.f32 %v1135_v28, %v1134_v25 }
 0x865   :  { %v845_v12 = vadd.f32 %v844_v7, %v843_v5 }
 0x866   :  { %v1137_v30 = vrot.slane %v1136_v29, 1  ;;  %v1554_v4 = vpop.eup %1553 }
 0x867   :  { %v798_v6 = vmul.f32 %v1554_v4, %v796_v61  ;;  %v846_v15 = vmul.f32 0.03125, %v845_v12 }
 0x868   :  { %v1138_v31 = vadd.f32 %v1137_v30, %v1136_v29 }
 0x869   :  { %v800_v8 = vsel %vm799_vm9, %v796_v61, %v798_v6  ;;  %v1231_v23 = vsel %vm1230_vm12, %v846_v15, 0.0 }
 0x86a   :  { %v1139_v32 = vmul.f32 0.05, %v1138_v31  ;;  %v803_v11 = vsel %vm801_vm10, %v802_v10, %v800_v8 }
 0x86b   :  { %v804_v13 = vmul.f32 0.0009765625, %v803_v11 }
 0x86c   :  { %1463 = vmatmul.mubr.f32.vlgmr.msra.gmra.mrb[16].mxu1 %v1139_v32 }
 0x86d   :  { %v1228_v19 = vsel %vm1227_vm11, %v804_v13, 0.0 }
 0x93f   :  { %v1223_v16 = vpop.f32.mrb[16].mxu1 }
 0x940   :  { %v1224_v17 = vadd.f32 %v1223_v16, %v1156_v14  ;;  %v1464_v18 = vpop.f32.mrb[17].mxu1 }
 0x942   :  { %v1229_v22 = vadd.f32 %v1228_v19, %v1224_v17 }
 0x944   :  { %v1232_v24 = vadd.f32 %v1231_v23, %v1229_v22 }
 0x946   :  { %1233 = vst [vmem:[%s1835_s8] sm:$0x1] %v1232_v24 }
 0x947   :  { %1238 = vsyncpa [#allocation4], 1 }
 0x948   :  { %1239 = vsyncpa [#allocation6], 1 }

</bundles_post_ra>
